<compile_context>
chip_gen: v6e
topology: v6e:2x2x1
jax: 0.10.0
libtpu: 0.0.40
codegen_flags: <defaults>
</compile_context>

<pallas_src>
import numpy as np
import jax
import jax.numpy as jnp
from jax import lax
from jax.experimental import pallas as pl
from jax.experimental.pallas import tpu as pltpu

NEG_SLOPE = 0.01   # torch.nn.LeakyReLU default
HIDDEN = 32        # hidden width of each per-dim MLP block


def _leaky_relu(x):
    return jnp.where(x > 0, x, NEG_SLOPE * x)


def _elu(x):
    # exp only on the clamped negative branch -> no inf on the discarded lane.
    return jnp.where(x > 0, x, jnp.exp(jnp.minimum(x, 0.0)) - 1.0)


def _make_kernel(n_batch, N, N_pad, lower_bound):
    lb = float(lower_bound)
    inv_nm1 = 1.0 / float(N - 1)

    def kernel(data_ref, w1m_ref, wmat_ref, bcol_ref, lin_ref, o_ref):
        d = data_ref[...]                                   # (16, M), M = n_batch * N_pad
        # Rows 8..15 hold [z0_rep; z1_rep; lb+(N-1); lb*5]; clamp/scale turns them into
        # [dsz0; dsz1; 1; 0*5].  Padded bins carry lb -> dsz == 0 there, so they drop out
        # of the trapezoid sum automatically (no explicit mask needed).
        dsz = (jnp.maximum(d[8:16], lb) - lb) * inv_nm1      # (8, M)
        # Rows 0..7 hold [j+u (dim0); j+u (dim1); 1; 0*5]; scaling by dsz yields the MXU
        # RHS [dsz0*(j+u0); dsz1*(j+u1); 1; 0*5].  The "+lb" of the trapezoid split and
        # the layer-1 bias are folded into column 2 of the layer-1 weight matrix.
        rhs = d[0:8] * dsz                                   # (8, M)

        # Layer 1 (both dims fused) on the MXU, K = 8, bias + lower_bound folded in.
        h = jnp.dot(w1m_ref[...], rhs,
                    preferred_element_type=jnp.float32)      # (64, M)
        h = _leaky_relu(h)

        wm = wmat_ref[...]                                   # (72, 64)
        bc = bcol_ref[...]                                   # (64, 2)
        # Layer 2: block-diagonal (64, 64) -> one matmul covers both per-dim MLPs.
        h = jnp.dot(wm[0:64], h, preferred_element_type=jnp.float32) + bc[:, 0:1]
        h = _leaky_relu(h)
        # Layer 3: (8, 64), padded to a full sublane group; rows 0..1 are real.
        o = jnp.dot(wm[64:72], h, preferred_element_type=jnp.float32) + bc[0:8, 1:2]
        v = _elu(o[0:2]) + 1.0                               # (2, M)

        # Trapezoid accumulation: weight by dsz (zero on padded bins) and reduce each
        # batch's 128-lane chunk with a single full-lane reduction.
        hz = jnp.sum((v * dsz[0:2]).reshape(2, n_batch, N_pad), axis=-1)   # (2, n_batch)

        # Final Linear(2, 1); scalars live in SMEM; lane-dense (1, n_batch) output.
        o_ref[...] = lin_ref[0] * hz[0:1, :] + lin_ref[1] * hz[1:2, :] + lin_ref[2]

    return kernel


def init_params(key, hidden=HIDDEN):
    """Deterministic parameter init (PyTorch-Linear-style uniform bounds)."""
    dims = (1, hidden, hidden, 1)

    def init_mlp(k):
        ws, bs = [], []
        for din, dout in zip(dims[:-1], dims[1:]):
            k, k1, k2 = jax.random.split(k, 3)
            bound = 1.0 / np.sqrt(din)
            ws.append(jax.random.uniform(k1, (din, dout), jnp.float32, -bound, bound))
            bs.append(jax.random.uniform(k2, (1, dout), jnp.float32, -bound, bound))
        return tuple(ws), tuple(bs)

    k0, k1, k2, k3 = jax.random.split(key, 4)
    bound = 1.0 / np.sqrt(2.0)
    wl = jax.random.uniform(k2, (2, 1), jnp.float32, -bound, bound)
    bl = jax.random.uniform(k3, (1, 1), jnp.float32, -bound, bound)
    return {"z0": init_mlp(k0), "z1": init_mlp(k1), "lin": (wl, bl)}


def _pack_params(params, lower_bound, hidden=HIDDEN):
    """Pack the 14 small tensors into 3 VMEM arrays + 1 SMEM scalar triple."""
    (w01, w02, w03), (b01, b02, b03) = params["z0"]
    (w11, w12, w13), (b11, b12, b13) = params["z1"]
    wl, bl = params["lin"]
    H = hidden
    lb = float(lower_bound)
    zH = jnp.zeros((H,), jnp.float32)
    z2H = jnp.zeros((2 * H,), jnp.float32)

    # Layer-1 LHS (64, 8): cols [w_d0 | w_d1 | w*lb + b1 | 0*5].  The constant column
    # multiplies the all-ones RHS row, folding the layer-1 bias and the trapezoid "+lb".
    c0 = jnp.concatenate([w01.reshape(H), zH])
    c1 = jnp.concatenate([zH, w11.reshape(H)])
    c2 = jnp.concatenate([w01.reshape(H) * lb + b01.reshape(H),
                          w11.reshape(H) * lb + b11.reshape(H)])
    w1m = jnp.stack([c0, c1, c2, z2H, z2H, z2H, z2H, z2H], axis=1)        # (64, 8)

    # Layers 2+3 in one slab: rows 0:64 = block-diag layer-2 weight (stored (out, in)),
    # rows 64:72 = layer-3 weight padded to a full sublane group (rows 0/1 real).
    w2bd = jnp.zeros((2 * H, 2 * H), jnp.float32)
    w2bd = w2bd.at[:H, :H].set(w02.T).at[H:, H:].set(w12.T)
    w3p = jnp.zeros((8, 2 * H), jnp.float32)
    w3p = w3p.at[0, :H].set(w03.reshape(H)).at[1, H:].set(w13.reshape(H))
    wmat = jnp.concatenate([w2bd, w3p], axis=0)                           # (72, 64)

    # Bias columns: col 0 = layer-2 bias (both dims), col 1 rows 0..1 = layer-3 bias.
    b2c = jnp.concatenate([b02.reshape(H), b12.reshape(H)])
    b3c = z2H.at[0].set(b03[0, 0]).at[1].set(b13[0, 0])
    bcol = jnp.stack([b2c, b3c], axis=1)                                  # (64, 2)

    lin = jnp.array([wl[0, 0], wl[1, 0], bl[0, 0]], jnp.float32)          # SMEM scalars
    return w1m, wmat, bcol, lin


def _make_jitter(rng, n_batch, N, N_pad):
    """Uniform(0,1) draws for bins 0..N-2; bin N-1 and padded bins carry zero."""
    u = jax.random.uniform(rng, (n_batch, 2, N - 1), jnp.float32)
    u_full = jnp.zeros((n_batch, 2, N_pad), jnp.float32)
    return u_full.at[:, :, :N - 1].set(u)


def _pack_data(z, u_full, N, N_pad, lower_bound):
    """(16, M) lane-dense data slab (lane m = b*N_pad + bin): rows 0..7 feed the
    layer-1 RHS, rows 8..15 become the per-lane d_size multipliers in the kernel."""
    n_batch = z.shape[0]
    M = n_batch * N_pad
    lb = float(lower_bound)
    f32 = jnp.float32

    j = jnp.arange(N_pad, dtype=f32)
    u_t = jnp.transpose(jnp.asarray(u_full, f32), (1, 0, 2))        # (2, n_batch, N_pad)
    uj = (u_t + j).reshape(2, M)                                    # bin index folded into u
    z_rep = jnp.where(j[None, None, :] < N,
                      jnp.asarray(z, f32).T[:, :, None], lb).reshape(2, M)
    data = jnp.concatenate([
        uj,                                   # rows 0..1
        jnp.ones((1, M), f32),                # row 2: multiplies the folded bias column
        jnp.zeros((5, M), f32),               # rows 3..7: K padding for the layer-1 matmul
        z_rep,                                # rows 8..9: -> dsz per lane (0 on padded bins)
        jnp.full((1, M), lb + (N - 1), f32),  # row 10: -> dsz == 1 for the bias row
        jnp.full((5, M), lb, f32),            # rows 11..15: -> dsz == 0 for padding rows
    ], axis=0)
    return data                               # (16, M)


def monotone_forward(z, params, u_full, N=100, lower_bound=-0.5):
    n_batch, n_dim = z.shape
    assert n_dim == 2
    N_pad = u_full.shape[-1]
    assert N_pad % 128 == 0 and N_pad >= N

    data = _pack_data(z, u_full, N, N_pad, lower_bound)
    w1m, wmat, bcol, lin = _pack_params(params, lower_bound)

    vmem = pl.BlockSpec(memory_space=pltpu.MemorySpace.VMEM)
    smem = pl.BlockSpec(memory_space=pltpu.MemorySpace.SMEM)
    kernel = _make_kernel(n_batch, N, N_pad, lower_bound)

    out = pl.pallas_call(
        kernel,
        out_shape=jax.ShapeDtypeStruct((1, n_batch), jnp.float32),
        in_specs=[vmem, vmem, vmem, vmem, smem],
        out_specs=vmem,
    )(data, w1m, wmat, bcol, lin)
    return out.T                                                    # (n_batch, 1)


def reference_forward(z, params, u_full, N=100, lower_bound=-0.5):
    """Pure-JAX mirror of the PyTorch forward pass (same jitter draws)."""
    n_batch, _ = z.shape
    z_clamp = jnp.maximum(z, lower_bound)
    d_size = (z_clamp - lower_bound) / float(N - 1)                       # (n_batch, 2)
    d_order = jnp.arange(N, dtype=jnp.float32)
    z_split = d_size[:, :, None] * d_order[None, None, :] + lower_bound  # (n_batch, 2, N)
    z_random = z_split + u_full[:, :, :N] * d_size[:, :, None]           # last-bin jitter is 0

    def mlp(x_col, ws, bs):
        h = _leaky_relu(x_col @ ws[0] + bs[0])
        h = _leaky_relu(h @ ws[1] + bs[1])
        return _elu(h @ ws[2] + bs[2])

    v0 = mlp(z_random[:, 0, :].reshape(-1, 1), *params["z0"]) + 1.0
    v1 = mlp(z_random[:, 1, :].reshape(-1, 1), *params["z1"]) + 1.0
    Hz0 = v0.reshape(n_batch, N).sum(-1, keepdims=True) * d_size[:, 0:1]
    Hz1 = v1.reshape(n_batch, N).sum(-1, keepdims=True) * d_size[:, 1:2]
    wl, bl = params["lin"]
    return jnp.concatenate([Hz0, Hz1], axis=1) @ wl + bl


if __name__ == "__main__":
    key = jax.random.PRNGKey(0)
    kp, kz, kr = jax.random.split(key, 3)

    params = init_params(kp)
    n_batch, N, lower_bound = 8, 100, -0.5
    z = jax.random.normal(kz, (n_batch, 2), dtype=jnp.float32)

    N_pad = ((N + 127) // 128) * 128
    u_full = _make_jitter(kr, n_batch, N, N_pad)

    out = monotone_forward(z, params, u_full, N=N, lower_bound=lower_bound)
    out = jax.block_until_ready(out)

    ref = reference_forward(z, params, u_full, N=N, lower_bound=lower_bound)
    assert out.shape == (n_batch, 1) and out.dtype == jnp.float32
    np.testing.assert_allclose(np.asarray(out), np.asarray(ref), rtol=1e-2, atol=1e-2)

    print("KERNEL_OK")
</pallas_src>

<mosaic_0001>
module attributes {stable_mosaic.version = 11 : i64} {
  func.func @kernel(%arg0: memref<16x1024xf32, #tpu.memory_space<vmem>>, %arg1: memref<64x8xf32, #tpu.memory_space<vmem>>, %arg2: memref<72x64xf32, #tpu.memory_space<vmem>>, %arg3: memref<64x2xf32, #tpu.memory_space<vmem>>, %arg4: memref<3xf32, #tpu.memory_space<smem>>, %arg5: memref<1x8xf32, #tpu.memory_space<vmem>>) attributes {dimension_semantics = [], scalar_prefetch = 0 : i64, scratch_operands = 0 : i64, tpu.core_type = #tpu.core_type<tc>} {
    %c0 = arith.constant 0 : index
    %c0_0 = arith.constant 0 : index
    %0 = vector.load %arg0[%c0, %c0_0] : memref<16x1024xf32, #tpu.memory_space<vmem>>, vector<16x1024xf32>
    %1 = vector.extract_strided_slice %0 {offsets = [8, 0], sizes = [8, 1024], strides = [1, 1]} : vector<16x1024xf32> to vector<8x1024xf32>
    %cst = arith.constant -5.000000e-01 : f32
    %2 = vector.broadcast %cst : f32 to vector<8x1024xf32>
    %3 = arith.maximumf %1, %2 : vector<8x1024xf32>
    %cst_1 = arith.constant -5.000000e-01 : f32
    %4 = vector.broadcast %cst_1 : f32 to vector<8x1024xf32>
    %5 = arith.subf %3, %4 : vector<8x1024xf32>
    %cst_2 = arith.constant 0.0101010101 : f32
    %6 = vector.broadcast %cst_2 : f32 to vector<8x1024xf32>
    %7 = arith.mulf %5, %6 : vector<8x1024xf32>
    %8 = vector.extract_strided_slice %0 {offsets = [0, 0], sizes = [8, 1024], strides = [1, 1]} : vector<16x1024xf32> to vector<8x1024xf32>
    %9 = arith.mulf %8, %7 : vector<8x1024xf32>
    %c0_3 = arith.constant 0 : index
    %c0_4 = arith.constant 0 : index
    %10 = vector.load %arg1[%c0_3, %c0_4] : memref<64x8xf32, #tpu.memory_space<vmem>>, vector<64x8xf32>
    %cst_5 = arith.constant dense<0.000000e+00> : vector<64x1024xf32>
    %11 = tpu.matmul %10, %9, %cst_5 {dimension_numbers = #tpu.dot_dimension_numbers<[1], [0], [0], [1], [0, 0, 1, 1], [], []>} : vector<64x8xf32>, vector<8x1024xf32>, vector<64x1024xf32> -> vector<64x1024xf32>
    %cst_6 = arith.constant 0.000000e+00 : f32
    %12 = vector.broadcast %cst_6 : f32 to vector<64x1024xf32>
    %13 = arith.cmpf ogt, %11, %12 : vector<64x1024xf32>
    %cst_7 = arith.constant 0.00999999977 : f32
    %14 = vector.broadcast %cst_7 : f32 to vector<64x1024xf32>
    %15 = arith.mulf %14, %11 : vector<64x1024xf32>
    %16 = arith.select %13, %11, %15 : vector<64x1024xi1>, vector<64x1024xf32>
    %c0_8 = arith.constant 0 : index
    %c0_9 = arith.constant 0 : index
    %17 = vector.load %arg2[%c0_8, %c0_9] : memref<72x64xf32, #tpu.memory_space<vmem>>, vector<72x64xf32>
    %c0_10 = arith.constant 0 : index
    %c0_11 = arith.constant 0 : index
    %18 = vector.load %arg3[%c0_10, %c0_11] : memref<64x2xf32, #tpu.memory_space<vmem>>, vector<64x2xf32>
    %19 = vector.extract_strided_slice %17 {offsets = [0, 0], sizes = [64, 64], strides = [1, 1]} : vector<72x64xf32> to vector<64x64xf32>
    %cst_12 = arith.constant dense<0.000000e+00> : vector<64x1024xf32>
    %20 = tpu.matmul %19, %16, %cst_12 {dimension_numbers = #tpu.dot_dimension_numbers<[1], [0], [0], [1], [0, 0, 1, 1], [], []>} : vector<64x64xf32>, vector<64x1024xf32>, vector<64x1024xf32> -> vector<64x1024xf32>
    %21 = vector.extract_strided_slice %18 {offsets = [0, 0], sizes = [64, 1], strides = [1, 1]} : vector<64x2xf32> to vector<64x1xf32>
    %22 = vector.broadcast %21 : vector<64x1xf32> to vector<64x1024xf32>
    %23 = arith.addf %20, %22 : vector<64x1024xf32>
    %cst_13 = arith.constant 0.000000e+00 : f32
    %24 = vector.broadcast %cst_13 : f32 to vector<64x1024xf32>
    %25 = arith.cmpf ogt, %23, %24 : vector<64x1024xf32>
    %cst_14 = arith.constant 0.00999999977 : f32
    %26 = vector.broadcast %cst_14 : f32 to vector<64x1024xf32>
    %27 = arith.mulf %26, %23 : vector<64x1024xf32>
    %28 = arith.select %25, %23, %27 : vector<64x1024xi1>, vector<64x1024xf32>
    %29 = vector.extract_strided_slice %17 {offsets = [64, 0], sizes = [8, 64], strides = [1, 1]} : vector<72x64xf32> to vector<8x64xf32>
    %cst_15 = arith.constant dense<0.000000e+00> : vector<8x1024xf32>
    %30 = tpu.matmul %29, %28, %cst_15 {dimension_numbers = #tpu.dot_dimension_numbers<[1], [0], [0], [1], [0, 0, 1, 1], [], []>} : vector<8x64xf32>, vector<64x1024xf32>, vector<8x1024xf32> -> vector<8x1024xf32>
    %31 = vector.extract_strided_slice %18 {offsets = [0, 1], sizes = [8, 1], strides = [1, 1]} : vector<64x2xf32> to vector<8x1xf32>
    %32 = vector.broadcast %31 : vector<8x1xf32> to vector<8x1024xf32>
    %33 = arith.addf %30, %32 : vector<8x1024xf32>
    %34 = vector.extract_strided_slice %33 {offsets = [0, 0], sizes = [2, 1024], strides = [1, 1]} : vector<8x1024xf32> to vector<2x1024xf32>
    %cst_16 = arith.constant 0.000000e+00 : f32
    %35 = vector.broadcast %cst_16 : f32 to vector<2x1024xf32>
    %36 = arith.cmpf ogt, %34, %35 : vector<2x1024xf32>
    %cst_17 = arith.constant 0.000000e+00 : f32
    %37 = vector.broadcast %cst_17 : f32 to vector<2x1024xf32>
    %38 = arith.minimumf %34, %37 : vector<2x1024xf32>
    %39 = math.exp %38 : vector<2x1024xf32>
    %cst_18 = arith.constant 1.000000e+00 : f32
    %40 = vector.broadcast %cst_18 : f32 to vector<2x1024xf32>
    %41 = arith.subf %39, %40 : vector<2x1024xf32>
    %42 = arith.select %36, %34, %41 : vector<2x1024xi1>, vector<2x1024xf32>
    %cst_19 = arith.constant 1.000000e+00 : f32
    %43 = vector.broadcast %cst_19 : f32 to vector<2x1024xf32>
    %44 = arith.addf %42, %43 : vector<2x1024xf32>
    %45 = vector.extract_strided_slice %7 {offsets = [0, 0], sizes = [2, 1024], strides = [1, 1]} : vector<8x1024xf32> to vector<2x1024xf32>
    %46 = arith.mulf %44, %45 : vector<2x1024xf32>
    %47 = vector.shape_cast %46 : vector<2x1024xf32> to vector<2x8x128xf32>
    %cst_20 = arith.constant dense<0.000000e+00> : vector<2x8xf32>
    %48 = vector.multi_reduction <add>, %47, %cst_20 [2] : vector<2x8x128xf32> to vector<2x8xf32>
    %c0_21 = arith.constant 0 : index
    %49 = memref.load %arg4[%c0_21] : memref<3xf32, #tpu.memory_space<smem>>
    %50 = vector.extract_strided_slice %48 {offsets = [0, 0], sizes = [1, 8], strides = [1, 1]} : vector<2x8xf32> to vector<1x8xf32>
    %51 = vector.broadcast %49 : f32 to vector<1x8xf32>
    %52 = arith.mulf %51, %50 : vector<1x8xf32>
    %c1 = arith.constant 1 : index
    %53 = memref.load %arg4[%c1] : memref<3xf32, #tpu.memory_space<smem>>
    %54 = vector.extract_strided_slice %48 {offsets = [1, 0], sizes = [1, 8], strides = [1, 1]} : vector<2x8xf32> to vector<1x8xf32>
    %55 = vector.broadcast %53 : f32 to vector<1x8xf32>
    %56 = arith.mulf %55, %54 : vector<1x8xf32>
    %57 = arith.addf %52, %56 : vector<1x8xf32>
    %c2 = arith.constant 2 : index
    %58 = memref.load %arg4[%c2] : memref<3xf32, #tpu.memory_space<smem>>
    %59 = vector.broadcast %58 : f32 to vector<1x8xf32>
    %60 = arith.addf %57, %59 : vector<1x8xf32>
    %c0_22 = arith.constant 0 : index
    %c0_23 = arith.constant 0 : index
    %61 = vector.load %arg5[%c0_22, %c0_23] : memref<1x8xf32, #tpu.memory_space<vmem>>, vector<1x8xf32>
    tpu.vector_store %arg5[%c0_22, %c0_23], %60 {strides = array<i32>} : memref<1x8xf32, #tpu.memory_space<vmem>>, vector<1x8xf32>,
    return
  }
}

</mosaic_0001>

<bundles_post_ra>
// kernel: tpu_custom_call.1
= control target key start
LH: loop header
LB: loop body
LE: loop exit
PB: predicated region body
PF: predicated region fallthrough
CT: control target
= control target key end

     0   :  { %10 = vsyncpa [#allocation4], 0  ;;  %s3469_s0 = inlined_call_operand.vmem [shape: f32[16,1024], index: 0, kind: input, shape index: {}]   ;;  %s3470_s1 = inlined_call_operand.vmem [shape: f32[64,8], index: 1, kind: input, shape index: {}]   ;;  %s3471_s2 = inlined_call_operand.vmem [shape: f32[72,64], index: 2, kind: input, shape index: {}]   ;;  %s3472_s3 = inlined_call_operand.vmem [shape: f32[64,2], index: 3, kind: input, shape index: {}]   ;;  %s3473_s4 = inlined_call_operand.vmem [shape: f32[3], index: 4, kind: input, shape index: {}]   ;;  %s3474_s5 = inlined_call_operand.hbm [shape: f32[1,8], index: 5, kind: output, shape index: {}]  }
   0x1   :  { %11 = vsyncpa [#allocation3], 0  ;;  %s26_s20 = sshll.u32 %s3473_s4, 4  ;;  %s27_s20 = int_to_ptr.vmem [resolvable:$true] %s26_s20 }
   0x2   :  { %s2041_s21 = scalar_lea.vmem %s27_s20, 16  ;;  %p2046_p1 = scmp.lt.s32.totalorder %s27_s20, %s27_s20 }
   0x3   :  { %p2042_p0 = scmp.ne.s32.totalorder %s27_s20, %s2041_s21  ;;  %p2047_p2 = scmp.lt.s32.totalorder %s2041_s21, %s2041_s21 }
   0x5   :  { %p2048_p3 = por %p2047_p2, %p2046_p1 }
   0x7   :  { %p2049_p4 = pnand %p2048_p3, %p2042_p0 }
   0x9   :  { %2052 = shalt.err (!%p2049_p4)
}
   0xa   :  { %s2077_s22 = smov [#allocation2]  }
   0xb   :  { %29 = dma.vmem_to_smem %s27_s20, 16, %s2077_s22, [#allocation4]  }
   0xc   :  { %2073 = dma.done.wait [#allocation4], 16  }
   0xd   :  { %2074 = vsyncadd [#allocation4], 4294967280 }
   0xe   :  { %33 = sfence }
   0xf   :  { %v43_v0 = vld [vmem:[%s3469_s0 + $0x48] sm:$0xff]  ;;  %v45_v2 = vld [vmem:[%s3469_s0 + $0x58] sm:$0xff]  ;;  %v42_v3 = vld [vmem:[%s3469_s0 + $0x40] sm:$0xff]  ;;  %v3475_v4 = vmov 0.0   ;;  %vm90_vm0 = vcmask 64512   ;;  %v2079_v57 = vmov 0  }
  0x10   :  { %v51_v1 = vmax.f32 %v43_v0, -0.5  ;;  %179 = vmatprep.mubr.f32.mxu0 %v3475_v4  ;;  %292 = vmatprep.mubr.f32.mxu1 %v3475_v4  ;;  %v53_v5 = vmax.f32 %v45_v2, -0.5  ;;  %v50_v6 = vmax.f32 %v42_v3, -0.5  ;;  %v44_v7 = vld [vmem:[%s3469_s0 + $0x50] sm:$0xff]  ;;  %v35_v10 = vld [vmem:[%s3469_s0 + $0x8] sm:$0xff]  ;;  %v37_v11 = vld [vmem:[%s3469_s0 + $0x18] sm:$0xff] }
  0x11   :  { %v52_v9 = vmax.f32 %v44_v7, -0.5  ;;  %v47_v14 = vld [vmem:[%s3469_s0 + $0x68] sm:$0xff]  ;;  %v34_v16 = vld [vmem:[%s3469_s0] sm:$0xff]  ;;  %v49_v19 = vld [vmem:[%s3469_s0 + $0x78] sm:$0xff]  ;;  %2023 = vset.pattern.permute.xlu1 %v2079_v57  ;;  %2022 = vset.pattern.permute.xlu0 %v2079_v57  ;;  %s1894_s22 = sld [smem:[#allocation2]]  ;;  %s2083_s24 = smov [#allocation5]  }
  0x12   :  { %v1930_v8 = vadd.f32 0.5, %v51_v1  ;;  %v1932_v12 = vadd.f32 0.5, %v53_v5  ;;  %v1929_v13 = vadd.f32 0.5, %v50_v6  ;;  %v55_v18 = vmax.f32 %v47_v14, -0.5  ;;  %v36_v22 = vld [vmem:[%s3469_s0 + $0x10] sm:$0xff]  ;;  %v46_v27 = vld [vmem:[%s3469_s0 + $0x60] sm:$0xff] }
  0x13   :  { %v1931_v17 = vadd.f32 0.5, %v52_v9  ;;  %v57_v23 = vmax.f32 %v49_v19, -0.5  ;;  %v48_v28 = vld [vmem:[%s3469_s0 + $0x70] sm:$0xff]  ;;  %v2169_v31 = vld [vmem:[%s3470_s1] sm:$0xff]  ;;  %v39_v32 = vld [vmem:[%s3469_s0 + $0x28] sm:$0xff]  ;;  %v54_v34 = vmax.f32 %v46_v27, -0.5 }
  0x14   :  { %v2140_v15 = vmul.f32 0.01010101, %v1930_v8  ;;  %v2148_v20 = vmul.f32 0.01010101, %v1932_v12  ;;  %v2150_v21 = vmul.f32 0.01010101, %v1929_v13 }
  0x15   :  { %v2156_v25 = vmul.f32 0.01010101, %v1931_v17  ;;  %v1934_v26 = vadd.f32 0.5, %v55_v18  ;;  %v1936_v33 = vadd.f32 0.5, %v57_v23  ;;  %v41_v37 = vld [vmem:[%s3469_s0 + $0x38] sm:$0xff]  ;;  %v56_v38 = vmax.f32 %v48_v28, -0.5 }
  0x16   :  { %3506 = vst [vmem:[#allocation8_spill] sm:$0xff] %v2140_v15  ;;  %3507 = vst [vmem:[#allocation9_spill] sm:$0xff] %v2148_v20  ;;  %v75_v24 = vmul.f32 %v2140_v15, %v35_v10  ;;  %v77_v29 = vmul.f32 %v2148_v20, %v37_v11  ;;  %v74_v30 = vmul.f32 %v2150_v21, %v34_v16  ;;  %v1933_v40 = vadd.f32 0.5, %v54_v34  ;;  %v38_v42 = vld [vmem:[%s3469_s0 + $0x20] sm:$0xff]  ;;  %v83_v44 = vld [vmem:[%s3470_s1 + $0x8] sm:$0xff]  ;;  %s2014_s23 = sld [smem:[#allocation2 + $0x2]] }
  0x17   :  { %3508 = vst [vmem:[#allocation10_spill] sm:$0xff] %v2150_v21  ;;  %3509 = vst [vmem:[#allocation11_spill] sm:$0xff] %v2156_v25  ;;  %v76_v35 = vmul.f32 %v2156_v25, %v36_v22  ;;  %v2175_v36 = vmul.f32 0.01010101, %v1934_v26  ;;  %v2180_v39 = vmul.f32 0.01010101, %v1936_v33 }
  0x18   :  { %145 = vmatprep.subr.mxu0 %v75_v24  ;;  %258 = vmatprep.subr.mxu1 %v77_v29  ;;  %v1935_v43 = vadd.f32 0.5, %v56_v38  ;;  %v2195_v46 = vmul.f32 0.01010101, %v1933_v40  ;;  %v40_v47 = vld [vmem:[%s3469_s0 + $0x30] sm:$0xff]  ;;  %v85_v52 = vld [vmem:[%s3470_s1 + $0x18] sm:$0xff]  ;;  %v86_v53 = vld [vmem:[%s3470_s1 + $0x20] sm:$0xff] }
  0x19   :  { %3510 = vst [vmem:[#allocation12_spill] sm:$0xff] %v2175_v36  ;;  %146 = vmatpush1.msra.mxu0 %v74_v30  ;;  %3511 = vst [vmem:[#allocation13_spill] sm:$0xff] %v2180_v39  ;;  %259 = vmatpush1.msra.mxu1 %v76_v35  ;;  %v79_v41 = vmul.f32 %v2175_v36, %v39_v32  ;;  %v81_v45 = vmul.f32 %v2180_v39, %v41_v37  ;;  %v84_v51 = vld [vmem:[%s3470_s1 + $0x10] sm:$0xff]  ;;  %v87_v54 = vld [vmem:[%s3470_s1 + $0x28] sm:$0xff]  ;;  %s1920_s25 = sshll.u32 %s2083_s24, 4  ;;  %s1921_s25 = int_to_ptr.vmem [resolvable:$true] %s1920_s25 }
  0x1a   :  { %1937 = vmatmul.mubr.msk.f32.vlgmr.msra.gmra.mxu0 %vm90_vm0, %v2169_v31  ;;  %1945 = vmatmul.mubr.msk.f32.vlgmr.msra.gmra.mxu1 %vm90_vm0, %v2169_v31  ;;  %3512 = vst [vmem:[#allocation14_spill] sm:$0xff] %v2195_v46  ;;  %v2201_v48 = vmul.f32 0.01010101, %v1935_v43  ;;  %v78_v49 = vmul.f32 %v2195_v46, %v38_v42  ;;  %v88_v55 = vld [vmem:[%s3470_s1 + $0x30] sm:$0xff]  ;;  %v89_v56 = vld [vmem:[%s3470_s1 + $0x38] sm:$0xff]  ;;  %v773_v58 = vld [vmem:[%s3472_s3 + $0x28] sm:$0xff]  ;;  %p2058_p6 = scmp.lt.s32.totalorder %s1921_s25, %s1921_s25 }
  0x1b   :  { %185 = vmatprep.mubr.f32.mxu0 %v3475_v4  ;;  %298 = vmatprep.mubr.f32.mxu1 %v3475_v4  ;;  %v775_v59 = vld [vmem:[%s3472_s3 + $0x38] sm:$0xff]  ;;  %v772_v60 = vld [vmem:[%s3472_s3 + $0x20] sm:$0xff]  ;;  %v774_v61 = vld [vmem:[%s3472_s3 + $0x30] sm:$0xff]  ;;  %s2053_s4 = scalar_lea.vmem %s1921_s25, 16  ;;  %s2057_s26 = scalar_lea.vmem %s1921_s25, 32 }
  0x1c   :  { %371 = vmatprep.subr.mxu0 %v79_v41  ;;  %3513 = vst [vmem:[#allocation15_spill] sm:$0xff] %v2201_v48  ;;  %484 = vmatprep.subr.mxu1 %v81_v45  ;;  %v80_v50 = vmul.f32 %v2201_v48, %v40_v47  ;;  %v770_v62 = vld [vmem:[%s3472_s3 + $0x10] sm:$0xff]  ;;  %v771_v63 = vld [vmem:[%s3472_s3 + $0x18] sm:$0xff]  ;;  %v2306_v0 = vld [vmem:[%s3472_s3] sm:$0xff]  ;;  %p2054_p5 = scmp.ne.s32.totalorder %s1921_s25, %s2053_s4  ;;  %p2059_p7 = scmp.lt.s32.totalorder %s2057_s26, %s2053_s4 }
  0x1d   :  { %372 = vmatpush1.msra.mxu0 %v78_v49  ;;  %803 = vperm.xlu1 %2023, %v773_v58   ;;  %v769_v2 = vld [vmem:[%s3472_s3 + $0x8] sm:$0xff] }
  0x1e   :  { %1938 = vmatmul.mubr.msk.f32.gmra.mxu0 %vm90_vm0, %v83_v44  ;;  %1946 = vmatmul.mubr.msk.f32.gmra.mxu1 %vm90_vm0, %v83_v44  ;;  %p2060_p8 = por %p2059_p7, %p2058_p6 }
  0x1f   :  { %191 = vmatprep.mubr.f32.mxu0 %v3475_v4  ;;  %304 = vmatprep.mubr.f32.mxu1 %v3475_v4 }
  0x20   :  { %485 = vmatpush1.msra.mxu1 %v80_v50  ;;  %813 = vperm.xlu0 %2022, %v775_v59   ;;  %p2061_p9 = pnand %p2060_p8, %p2054_p5 }
  0x21   :  { %798 = vperm.xlu1 %2023, %v772_v60  }
  0x22   :  { %1939 = vmatmul.mubr.msk.f32.gmra.mxu0 %vm90_vm0, %v84_v51  ;;  %1947 = vmatmul.mubr.msk.f32.gmra.mxu1 %vm90_vm0, %v84_v51 }
  0x23   :  { %197 = vmatprep.mubr.f32.mxu0 %v3475_v4  ;;  %310 = vmatprep.mubr.f32.mxu1 %v3475_v4 }
  0x24   :  { %808 = vperm.xlu0 %2022, %v774_v61  }
  0x25   :  { %788 = vperm.xlu1 %2023, %v770_v62  }
  0x26   :  { %1940 = vmatmul.mubr.msk.f32.gmra.mxu0 %vm90_vm0, %v85_v52  ;;  %1948 = vmatmul.mubr.msk.f32.gmra.mxu1 %vm90_vm0, %v85_v52 }
  0x27   :  { %203 = vmatprep.mubr.f32.mxu0 %v3475_v4  ;;  %316 = vmatprep.mubr.f32.mxu1 %v3475_v4 }
  0x28   :  { %793 = vperm.xlu0 %2022, %v771_v63  }
  0x29   :  { %778 = vperm.xlu1 %2023, %v2306_v0  }
  0x2a   :  { %1941 = vmatmul.mubr.msk.f32.gmra.mxu0 %vm90_vm0, %v86_v53  ;;  %1949 = vmatmul.mubr.msk.f32.gmra.mxu1 %vm90_vm0, %v86_v53 }
  0x2b   :  { %209 = vmatprep.mubr.f32.mxu0 %v3475_v4  ;;  %322 = vmatprep.mubr.f32.mxu1 %v3475_v4 }
  0x2c   :  { %783 = vperm.xlu0 %2022, %v769_v2  }
  0x2e   :  { %1942 = vmatmul.mubr.msk.f32.gmra.mxu0 %vm90_vm0, %v87_v54  ;;  %1950 = vmatmul.mubr.msk.f32.gmra.mxu1 %vm90_vm0, %v87_v54 }
  0x2f   :  { %215 = vmatprep.mubr.f32.mxu0 %v3475_v4  ;;  %328 = vmatprep.mubr.f32.mxu1 %v3475_v4 }
  0x32   :  { %1943 = vmatmul.mubr.msk.f32.gmra.mxu0 %vm90_vm0, %v88_v55  ;;  %1951 = vmatmul.mubr.msk.f32.gmra.mxu1 %vm90_vm0, %v88_v55 }
  0x33   :  { %221 = vmatprep.mubr.f32.mxu0 %v3475_v4  ;;  %334 = vmatprep.mubr.f32.mxu1 %v3475_v4 }
  0x36   :  { %1944 = vmatmul.mubr.msk.f32.gmra.mxu0 %vm90_vm0, %v89_v56  ;;  %1952 = vmatmul.mubr.msk.f32.gmra.mxu1 %vm90_vm0, %v89_v56 }
  0x37   :  { %405 = vmatprep.mubr.f32.mxu0 %v3475_v4  ;;  %518 = vmatprep.mubr.f32.mxu1 %v3475_v4 }
  0x3a   :  { %1953 = vmatmul.mubr.msk.f32.vlgmr.msra.gmra.mxu0 %vm90_vm0, %v2169_v31  ;;  %1961 = vmatmul.mubr.msk.f32.vlgmr.msra.gmra.mxu1 %vm90_vm0, %v2169_v31 }
  0x3b   :  { %411 = vmatprep.mubr.f32.mxu0 %v3475_v4  ;;  %524 = vmatprep.mubr.f32.mxu1 %v3475_v4 }
  0x3e   :  { %1954 = vmatmul.mubr.msk.f32.gmra.mxu0 %vm90_vm0, %v83_v44  ;;  %1962 = vmatmul.mubr.msk.f32.gmra.mxu1 %vm90_vm0, %v83_v44 }
  0x3f   :  { %417 = vmatprep.mubr.f32.mxu0 %v3475_v4  ;;  %530 = vmatprep.mubr.f32.mxu1 %v3475_v4 }
  0x42   :  { %1955 = vmatmul.mubr.msk.f32.gmra.mxu0 %vm90_vm0, %v84_v51  ;;  %1963 = vmatmul.mubr.msk.f32.gmra.mxu1 %vm90_vm0, %v84_v51 }
  0x43   :  { %423 = vmatprep.mubr.f32.mxu0 %v3475_v4  ;;  %536 = vmatprep.mubr.f32.mxu1 %v3475_v4 }
  0x46   :  { %1956 = vmatmul.mubr.msk.f32.gmra.mxu0 %vm90_vm0, %v85_v52  ;;  %1964 = vmatmul.mubr.msk.f32.gmra.mxu1 %vm90_vm0, %v85_v52 }
  0x47   :  { %429 = vmatprep.mubr.f32.mxu0 %v3475_v4  ;;  %542 = vmatprep.mubr.f32.mxu1 %v3475_v4 }
  0x4a   :  { %1957 = vmatmul.mubr.msk.f32.gmra.mxu0 %vm90_vm0, %v86_v53  ;;  %1965 = vmatmul.mubr.msk.f32.gmra.mxu1 %vm90_vm0, %v86_v53 }
  0x4b   :  { %435 = vmatprep.mubr.f32.mxu0 %v3475_v4  ;;  %548 = vmatprep.mubr.f32.mxu1 %v3475_v4 }
  0x4e   :  { %1958 = vmatmul.mubr.msk.f32.gmra.mxu0 %vm90_vm0, %v87_v54  ;;  %1966 = vmatmul.mubr.msk.f32.gmra.mxu1 %vm90_vm0, %v87_v54 }
  0x4f   :  { %441 = vmatprep.mubr.f32.mxu0 %v3475_v4  ;;  %554 = vmatprep.mubr.f32.mxu1 %v3475_v4 }
  0x52   :  { %1959 = vmatmul.mubr.msk.f32.gmra.mxu0 %vm90_vm0, %v88_v55  ;;  %1967 = vmatmul.mubr.msk.f32.gmra.mxu1 %vm90_vm0, %v88_v55 }
  0x53   :  { %447 = vmatprep.mubr.f32.mxu0 %v3475_v4  ;;  %560 = vmatprep.mubr.f32.mxu1 %v3475_v4 }
  0x56   :  { %1960 = vmatmul.mubr.msk.f32.gmra.mxu0 %vm90_vm0, %v89_v56  ;;  %1968 = vmatmul.mubr.msk.f32.gmra.mxu1 %vm90_vm0, %v89_v56 }
  0x57   :  { %905 = vmatprep.mubr.f32.mxu0 %v3475_v4  ;;  %1018 = vmatprep.mubr.f32.mxu1 %v3475_v4 }
  0xda   :  { %v2309_v1 = vpop.f32.mrf.mxu0  ;;  %v2314_v3 = vpop.f32.mrf.mxu1 }
  0xdb   :  { %v2363_v32 = vmul.f32 0.01, %v2309_v1 }
  0xdc   :  { %v2316_v5 = vpop.f32.mrf.mxu0  ;;  %v2318_v6 = vpop.f32.mrf.mxu1 }
  0xdd   :  { %v2366_v33 = vmul.f32 0.01, %v2316_v5 }
  0xde   :  { %v2320_v7 = vpop.f32.mrf.mxu0  ;;  %v2322_v8 = vpop.f32.mrf.mxu1 }
  0xdf   :  { %v2371_v35 = vmul.f32 0.01, %v2320_v7  ;;  %vm575_vm13 = vcmp.gt.f32.partialorder %v2320_v7, 0.0 }
  0xe0   :  { %v2324_v9 = vpop.f32.mrf.mxu0  ;;  %v2326_v10 = vpop.f32.mrf.mxu1 }
  0xe1   :  { %v2374_v37 = vmul.f32 0.01, %v2324_v9  ;;  %vm576_vm0 = vcmp.gt.f32.partialorder %v2324_v9, 0.0 }
  0xe2   :  { %v2328_v11 = vpop.f32.mrf.mxu0  ;;  %v2330_v12 = vpop.f32.mrf.mxu1 }
  0xe3   :  { %v2377_v38 = vmul.f32 0.01, %v2328_v11 }
  0xe4   :  { %v2332_v13 = vpop.f32.mrf.mxu0  ;;  %v2334_v14 = vpop.f32.mrf.mxu1 }
  0xe5   :  { %v2380_v41 = vmul.f32 0.01, %v2332_v13 }
  0xe6   :  { %v2336_v16 = vpop.f32.mrf.mxu0  ;;  %v2338_v17 = vpop.f32.mrf.mxu1 }
  0xe7   :  { %v2383_v42 = vmul.f32 0.01, %v2336_v16 }
  0xe8   :  { %v2340_v18 = vpop.f32.mrf.mxu0  ;;  %v2342_v19 = vpop.f32.mrf.mxu1 }
  0xe9   :  { %v2386_v43 = vmul.f32 0.01, %v2340_v18  ;;  %vm592_vm4 = vcmp.gt.f32.partialorder %v2340_v18, 0.0 }
  0xea   :  { %v2344_v22 = vpop.f32.mrf.mxu0  ;;  %v2346_v23 = vpop.f32.mrf.mxu1 }
  0xeb   :  { %v2389_v45 = vmul.f32 0.01, %v2344_v22  ;;  %vm599_vm3 = vcmp.gt.f32.partialorder %v2344_v22, 0.0 }
  0xec   :  { %v2348_v24 = vpop.f32.mrf.mxu0  ;;  %v2350_v26 = vpop.f32.mrf.mxu1 }
  0xed   :  { %vm600_vm1 = vcmp.gt.f32.partialorder %v2348_v24, 0.0  ;;  %v2393_v47 = vmul.f32 0.01, %v2348_v24 }
  0xee   :  { %v2352_v27 = vpop.f32.mrf.mxu0  ;;  %v2354_v28 = vpop.f32.mrf.mxu1 }
  0xef   :  { %vm607_vm2 = vcmp.gt.f32.partialorder %v2352_v27, 0.0  ;;  %v2398_v50 = vmul.f32 0.01, %v2352_v27  ;;  %v673_v25 = vmul.f32 0.01, %v2354_v28 }
  0xf0   :  { %v2356_v29 = vpop.f32.mrf.mxu0  ;;  %v2358_v30 = vpop.f32.mrf.mxu1 }
  0xf1   :  { %v672_v51 = vmul.f32 0.01, %v2356_v29  ;;  %vm608_vm5 = vcmp.gt.f32.partialorder %v2356_v29, 0.0  ;;  %v674_v39 = vmul.f32 0.01, %v2358_v30  ;;  %vm610_vm7 = vcmp.gt.f32.partialorder %v2358_v30, 0.0 }
  0xf2   :  { %v2360_v31 = vpop.f32.mrf.mxu0  ;;  %v2368_v34 = vpop.f32.mrf.mxu1 }
  0xf3   :  { %v679_v52 = vmul.f32 0.01, %v2360_v31  ;;  %vm615_vm14 = vcmp.gt.f32.partialorder %v2360_v31, 0.0  ;;  %v681_v63 = vmul.f32 0.01, %v2368_v34  ;;  %vm617_vm10 = vcmp.gt.f32.partialorder %v2368_v34, 0.0 }
  0xf4   :  { %v219_v40 = vpop.f32.mrf.mxu0  ;;  %v332_v44 = vpop.f32.mrf.mxu1 }
  0xf5   :  { %vm616_vm6 = vcmp.gt.f32.partialorder %v219_v40, 0.0  ;;  %v680_v54 = vmul.f32 0.01, %v219_v40  ;;  %v682_v60 = vmul.f32 0.01, %v332_v44  ;;  %vm618_vm15 = vcmp.gt.f32.partialorder %v332_v44, 0.0 }
  0xf6   :  { %v223_v49 = vpop.f32.mrf.mxu0  ;;  %v336_v53 = vpop.f32.mrf.mxu1 }
  0xf7   :  { %v687_v55 = vmul.f32 0.01, %v223_v49  ;;  %vm623_vm8 = vcmp.gt.f32.partialorder %v223_v49, 0.0  ;;  %v689_v57 = vmul.f32 0.01, %v336_v53  ;;  %vm625_vm11 = vcmp.gt.f32.partialorder %v336_v53, 0.0 }
  0xf8   :  { %v225_v56 = vpop.f32.mrf.mxu0  ;;  %v338_v59 = vpop.f32.mrf.mxu1 }
  0xf9   :  { %vm624_vm9 = vcmp.gt.f32.partialorder %v225_v56, 0.0  ;;  %v688_v58 = vmul.f32 0.01, %v225_v56  ;;  %vm626_vm12 = vcmp.gt.f32.partialorder %v338_v59, 0.0  ;;  %v690_v61 = vmul.f32 0.01, %v338_v59 }
  0xfa   :  { %v2406_v62 = vpop.f32.mrf.mxu0  ;;  %v2411_v2 = vpop.f32.mrf.mxu1  ;;  %v751_v46 = vsel %vm623_vm8, %v223_v49, %v687_v55  ;;  %vm609_vm8 = vcmp.gt.f32.partialorder %v2354_v28, 0.0  ;;  %v746_v55 = vsel %vm618_vm15, %v332_v44, %v682_v60  ;;  %v736_v44 = vsel %vm608_vm5, %v2356_v29, %v672_v51 }
  0xfb   :  { %v752_v4 = vsel %vm624_vm9, %v225_v56, %v688_v58  ;;  %v754_v48 = vsel %vm626_vm12, %v338_v59, %v690_v61  ;;  %v753_v56 = vsel %vm625_vm11, %v336_v53, %v689_v57  ;;  %v744_v58 = vsel %vm616_vm6, %v219_v40, %v680_v54 }
  0xfc   :  { %v2416_v36 = vpop.f32.mrf.mxu0  ;;  %857 = vmatprep.subr.mxu0 %v752_v4  ;;  %v2422_v21 = vpop.f32.mrf.mxu1  ;;  %970 = vmatprep.subr.mxu1 %v754_v48  ;;  %vm568_vm9 = vcmp.gt.f32.partialorder %v2316_v5, 0.0  ;;  %v666_v4 = vmul.f32 0.01, %v2350_v26  ;;  %vm567_vm11 = vcmp.gt.f32.partialorder %v2309_v1, 0.0  ;;  %v665_v48 = vmul.f32 0.01, %v2346_v23 }
  0xfd   :  { %858 = vmatpush1.msra.mxu0 %v751_v46  ;;  %971 = vmatpush1.msra.mxu1 %v753_v56  ;;  %v743_v46 = vsel %vm615_vm14, %v2360_v31, %v679_v52  ;;  %vm602_vm6 = vcmp.gt.f32.partialorder %v2350_v26, 0.0  ;;  %v745_v53 = vsel %vm617_vm10, %v2368_v34, %v681_v63  ;;  %v658_v31 = vmul.f32 0.01, %v2342_v19 }
  0xfe   :  { %v2429_v49 = vpop.f32.mrf.mxu0  ;;  %859 = vmatprep.subr.mxu0 %v744_v58  ;;  %v2438_v40 = vpop.f32.mrf.mxu1  ;;  %972 = vmatprep.subr.mxu1 %v746_v55  ;;  %vm601_vm12 = vcmp.gt.f32.partialorder %v2346_v23, 0.0  ;;  %v738_v54 = vsel %vm610_vm7, %v2358_v30, %v674_v39  ;;  %v735_v34 = vsel %vm607_vm2, %v2352_v27, %v2398_v50  ;;  %v657_v57 = vmul.f32 0.01, %v2338_v17 }
  0xff   :  { %860 = vmatpush1.msra.mxu0 %v743_v46  ;;  %973 = vmatpush1.msra.mxu1 %v745_v53  ;;  %vm594_vm5 = vcmp.gt.f32.partialorder %v2342_v19, 0.0  ;;  %v737_v51 = vsel %vm609_vm8, %v2354_v28, %v673_v25  ;;  %v728_v39 = vsel %vm600_vm1, %v2348_v24, %v2393_v47  ;;  %v650_v30 = vmul.f32 0.01, %v2334_v14 }
 0x100   :  { %v2448_v52 = vpop.f32.mrf.mxu0  ;;  %861 = vmatprep.subr.mxu0 %v736_v44  ;;  %v2459_v29 = vpop.f32.mrf.mxu1  ;;  %974 = vmatprep.subr.mxu1 %v738_v54  ;;  %vm593_vm2 = vcmp.gt.f32.partialorder %v2338_v17, 0.0  ;;  %v730_v50 = vsel %vm602_vm6, %v2350_v26, %v666_v4  ;;  %v727_v25 = vsel %vm599_vm3, %v2344_v22, %v2389_v45  ;;  %v649_v28 = vmul.f32 0.01, %v2330_v12 }
 0x101   :  { %862 = vmatpush1.msra.mxu0 %v735_v34  ;;  %975 = vmatpush1.msra.mxu1 %v737_v51  ;;  %vm586_vm1 = vcmp.gt.f32.partialorder %v2334_v14, 0.0  ;;  %v729_v47 = vsel %vm601_vm12, %v2346_v23, %v665_v48  ;;  %v720_v26 = vsel %vm592_vm4, %v2340_v18, %v2386_v43  ;;  %v642_v59 = vmul.f32 0.01, %v2326_v10  ;;  %v2603_v48 = vld [vmem:[%s3471_s2 + $0x10] sm:$0xff]  ;;  %v2616_v34 = vld [vmem:[%s3471_s2 + $0x18] sm:$0xff] }
 0x102   :  { %v2470_v27 = vpop.f32.mrf.mxu0  ;;  %863 = vmatprep.subr.mxu0 %v728_v39  ;;  %v2481_v24 = vpop.f32.mrf.mxu1  ;;  %976 = vmatprep.subr.mxu1 %v730_v50  ;;  %vm585_vm3 = vcmp.gt.f32.partialorder %v2330_v12, 0.0  ;;  %v722_v45 = vsel %vm594_vm5, %v2342_v19, %v658_v31  ;;  %vm3514_vm7 = vcmp.gt.f32.partialorder %v2336_v16, 0.0  ;;  %v641_v60 = vmul.f32 0.01, %v2322_v8 }
 0x103   :  { %864 = vmatpush1.msra.mxu0 %v727_v25  ;;  %977 = vmatpush1.msra.mxu1 %v729_v47  ;;  %v719_v23 = vsel %vm3514_vm7, %v2336_v16, %v2383_v42  ;;  %vm578_vm4 = vcmp.gt.f32.partialorder %v2326_v10, 0.0  ;;  %v721_v43 = vsel %vm593_vm2, %v2338_v17, %v657_v57  ;;  %vm3515_vm10 = vcmp.gt.f32.partialorder %v2332_v13, 0.0 }
 0x104   :  { %v2492_v22 = vpop.f32.mrf.mxu0  ;;  %865 = vmatprep.subr.mxu0 %v720_v26  ;;  %v2503_v18 = vpop.f32.mrf.mxu1  ;;  %978 = vmatprep.subr.mxu1 %v722_v45  ;;  %v712_v19 = vsel %vm3515_vm10, %v2332_v13, %v2380_v41  ;;  %v634_v61 = vmul.f32 0.01, %v2318_v6  ;;  %vm577_vm14 = vcmp.gt.f32.partialorder %v2322_v8, 0.0  ;;  %v714_v42 = vsel %vm586_vm1, %v2334_v14, %v650_v30 }
 0x105   :  { %866 = vmatpush1.msra.mxu0 %v719_v23  ;;  %979 = vmatpush1.msra.mxu1 %v721_v43  ;;  %vm3516_vm15 = vcmp.gt.f32.partialorder %v2328_v11, 0.0  ;;  %v633_v63 = vmul.f32 0.01, %v2314_v3  ;;  %vm570_vm8 = vcmp.gt.f32.partialorder %v2318_v6, 0.0  ;;  %v713_v41 = vsel %vm585_vm3, %v2330_v12, %v649_v28 }
 0x106   :  { %v2514_v16 = vpop.f32.mrf.mxu0  ;;  %867 = vmatprep.subr.mxu0 %v712_v19  ;;  %v711_v17 = vsel %vm3516_vm15, %v2328_v11, %v2377_v38  ;;  %v2525_v13 = vpop.f32.mrf.mxu1  ;;  %980 = vmatprep.subr.mxu1 %v714_v42  ;;  %v704_v14 = vsel %vm576_vm0, %v2324_v9, %v2374_v37  ;;  %vm569_vm6 = vcmp.gt.f32.partialorder %v2314_v3, 0.0  ;;  %v706_v38 = vsel %vm578_vm4, %v2326_v10, %v642_v59  ;;  %v2556_v10 = vld [vmem:[%s3471_s2] sm:$0xff] }
 0x107   :  { %868 = vmatpush1.msra.mxu0 %v711_v17  ;;  %981 = vmatpush1.msra.mxu1 %v713_v41  ;;  %v703_v12 = vsel %vm575_vm13, %v2320_v7, %v2371_v35  ;;  %v705_v9 = vsel %vm577_vm14, %v2322_v8, %v641_v60  ;;  %v696_v37 = vsel %vm568_vm9, %v2316_v5, %v2366_v33  ;;  %vm816_vm0 = vcmask 523264   ;;  %v2627_v59 = vld [vmem:[%s3471_s2 + $0x20] sm:$0xff] }
 0x108   :  { %v2535_v11 = vpop.f32.mrf.mxu0  ;;  %869 = vmatprep.subr.mxu0 %v704_v14  ;;  %v2544_v56 = vpop.f32.mrf.mxu1  ;;  %982 = vmatprep.subr.mxu1 %v706_v38  ;;  %v698_v35 = vsel %vm570_vm8, %v2318_v6, %v634_v61  ;;  %v695_v8 = vsel %vm567_vm11, %v2309_v1, %v2363_v32  ;;  %v697_v33 = vsel %vm569_vm6, %v2314_v3, %v633_v63  ;;  %v3517_v1 = vmov 0.0   ;;  %v2584_v32 = vld [vmem:[%s3471_s2 + $0x8] sm:$0xff] }
 0x109   :  { %870 = vmatpush1.msra.mxu0 %v703_v12  ;;  %983 = vmatpush1.msra.mxu1 %v705_v9  ;;  %v2647_v9 = vld [vmem:[%s3471_s2 + $0x28] sm:$0xff] }
 0x10a   :  { %v2558_v7 = vpop.f32.mrf.mxu0  ;;  %871 = vmatprep.subr.mxu0 %v696_v37  ;;  %v2567_v5 = vpop.f32.mrf.mxu1  ;;  %984 = vmatprep.subr.mxu1 %v698_v35 }
 0x10b   :  { %872 = vmatpush1.msra.mxu0 %v695_v8  ;;  %985 = vmatpush1.msra.mxu1 %v697_v33  ;;  %vm603_vm6 = vcmp.gt.f32.partialorder %v2558_v7, 0.0 }
 0x10c   :  { %v2572_v58 = vpop.f32.mrf.mxu0  ;;  %1969 = vmatmul.mubr.msk.f32.vlgmr.msra.gmra.mxu0 %vm816_vm0, %v2556_v10  ;;  %v2576_v6 = vpop.f32.mrf.mxu1  ;;  %1977 = vmatmul.mubr.msk.f32.vlgmr.msra.gmra.mxu1 %vm816_vm0, %v2556_v10 }
 0x10d   :  { %911 = vmatprep.mubr.f32.mxu0 %v3517_v1  ;;  %1024 = vmatprep.mubr.f32.mxu1 %v3517_v1  ;;  %v668_v23 = vmul.f32 0.01, %v2572_v58  ;;  %v670_v43 = vmul.f32 0.01, %v2576_v6  ;;  %vm604_vm15 = vcmp.gt.f32.partialorder %v2572_v58, 0.0  ;;  %vm606_vm8 = vcmp.gt.f32.partialorder %v2576_v6, 0.0 }
 0x10e   :  { %v2586_v4 = vpop.f32.mrf.mxu0  ;;  %v2589_v3 = vpop.f32.mrf.mxu1 }
 0x10f   :  { %v675_v37 = vmul.f32 0.01, %v2586_v4  ;;  %v677_v35 = vmul.f32 0.01, %v2589_v3  ;;  %vm611_vm10 = vcmp.gt.f32.partialorder %v2586_v4, 0.0  ;;  %vm613_vm14 = vcmp.gt.f32.partialorder %v2589_v3, 0.0 }
 0x110   :  { %v2591_v55 = vpop.f32.mrf.mxu0  ;;  %1970 = vmatmul.mubr.msk.f32.gmra.mxu0 %vm816_vm0, %v2584_v32  ;;  %v2595_v46 = vpop.f32.mrf.mxu1  ;;  %1978 = vmatmul.mubr.msk.f32.gmra.mxu1 %vm816_vm0, %v2584_v32 }
 0x111   :  { %917 = vmatprep.mubr.f32.mxu0 %v3517_v1  ;;  %1030 = vmatprep.mubr.f32.mxu1 %v3517_v1  ;;  %v676_v41 = vmul.f32 0.01, %v2591_v55  ;;  %v678_v14 = vmul.f32 0.01, %v2595_v46  ;;  %vm612_vm7 = vcmp.gt.f32.partialorder %v2591_v55, 0.0  ;;  %vm614_vm4 = vcmp.gt.f32.partialorder %v2595_v46, 0.0 }
 0x112   :  { %v2605_v53 = vpop.f32.mrf.mxu0  ;;  %v556_v44 = vpop.f32.mrf.mxu1 }
 0x113   :  { %v683_v19 = vmul.f32 0.01, %v2605_v53  ;;  %v685_v61 = vmul.f32 0.01, %v556_v44  ;;  %vm619_vm1 = vcmp.gt.f32.partialorder %v2605_v53, 0.0  ;;  %vm621_vm3 = vcmp.gt.f32.partialorder %v556_v44, 0.0 }
 0x114   :  { %v445_v31 = vpop.f32.mrf.mxu0  ;;  %1971 = vmatmul.mubr.msk.f32.gmra.mxu0 %vm816_vm0, %v2603_v48  ;;  %v558_v54 = vpop.f32.mrf.mxu1  ;;  %1979 = vmatmul.mubr.msk.f32.gmra.mxu1 %vm816_vm0, %v2603_v48 }
 0x115   :  { %923 = vmatprep.mubr.f32.mxu0 %v3517_v1  ;;  %1036 = vmatprep.mubr.f32.mxu1 %v3517_v1  ;;  %v684_v39 = vmul.f32 0.01, %v445_v31  ;;  %v686_v30 = vmul.f32 0.01, %v558_v54  ;;  %vm620_vm5 = vcmp.gt.f32.partialorder %v445_v31, 0.0  ;;  %vm622_vm2 = vcmp.gt.f32.partialorder %v558_v54, 0.0 }
 0x116   :  { %v449_v57 = vpop.f32.mrf.mxu0  ;;  %v562_v51 = vpop.f32.mrf.mxu1  ;;  %v747_v8 = vsel %vm619_vm1, %v2605_v53, %v683_v19  ;;  %v749_v33 = vsel %vm621_vm3, %v556_v44, %v685_v61  ;;  %v740_v53 = vsel %vm612_vm7, %v2591_v55, %v676_v41  ;;  %v742_v44 = vsel %vm614_vm4, %v2595_v46, %v678_v14 }
 0x117   :  { %v691_v50 = vmul.f32 0.01, %v449_v57  ;;  %v693_v28 = vmul.f32 0.01, %v562_v51  ;;  %vm627_vm9 = vcmp.gt.f32.partialorder %v449_v57, 0.0  ;;  %vm629_vm11 = vcmp.gt.f32.partialorder %v562_v51, 0.0 }
 0x118   :  { %v451_v25 = vpop.f32.mrf.mxu0  ;;  %1972 = vmatmul.mubr.msk.f32.gmra.mxu0 %vm816_vm0, %v2616_v34  ;;  %v564_v26 = vpop.f32.mrf.mxu1  ;;  %1980 = vmatmul.mubr.msk.f32.gmra.mxu1 %vm816_vm0, %v2616_v34  ;;  %v748_v38 = vsel %vm620_vm5, %v445_v31, %v684_v39  ;;  %v750_v12 = vsel %vm622_vm2, %v558_v54, %v686_v30  ;;  %v652_v31 = vmul.f32 0.01, %v2492_v22  ;;  %v654_v54 = vmul.f32 0.01, %v2503_v18 }
 0x119   :  { %vm628_vm13 = vcmp.gt.f32.partialorder %v451_v25, 0.0  ;;  %v692_v47 = vmul.f32 0.01, %v451_v25  ;;  %929 = vmatprep.mubr.f32.mxu0 %v3517_v1  ;;  %vm630_vm12 = vcmp.gt.f32.partialorder %v564_v26, 0.0  ;;  %v694_v45 = vmul.f32 0.01, %v564_v26  ;;  %1042 = vmatprep.mubr.f32.mxu1 %v3517_v1 }
 0x11a   :  { %v755_v17 = vsel %vm627_vm9, %v449_v57, %v691_v50  ;;  %v757_v63 = vsel %vm629_vm11, %v562_v51, %v693_v28  ;;  %v667_v57 = vmul.f32 0.01, %v2558_v7  ;;  %v669_v51 = vmul.f32 0.01, %v2567_v5 }
 0x11b   :  { %v756_v60 = vsel %vm628_vm13, %v451_v25, %v692_v47  ;;  %v758_v42 = vsel %vm630_vm12, %v564_v26, %v694_v45  ;;  %vm605_vm13 = vcmp.gt.f32.partialorder %v2567_v5, 0.0  ;;  %v739_v39 = vsel %vm611_vm10, %v2586_v4, %v675_v37  ;;  %v2696_v4 = vld [vmem:[%s3471_s2 + $0x30] sm:$0xff] }
 0x11c   :  { %1973 = vmatmul.mubr.msk.f32.gmra.mxu0 %vm816_vm0, %v2627_v59  ;;  %1083 = vmatprep.subr.mxu0 %v756_v60  ;;  %v741_v30 = vsel %vm613_vm14, %v2589_v3, %v677_v35  ;;  %v660_v55 = vmul.f32 0.01, %v2535_v11  ;;  %v662_v50 = vmul.f32 0.01, %v2544_v56  ;;  %v732_v46 = vsel %vm604_vm15, %v2572_v58, %v668_v23 }
 0x11d   :  { %1981 = vmatmul.mubr.msk.f32.gmra.mxu1 %vm816_vm0, %v2627_v59  ;;  %1196 = vmatprep.subr.mxu1 %v758_v42  ;;  %v734_v25 = vsel %vm606_vm8, %v2576_v6, %v670_v43  ;;  %v659_v3 = vmul.f32 0.01, %v2514_v16  ;;  %v661_v28 = vmul.f32 0.01, %v2525_v13  ;;  %vm596_vm9 = vcmp.gt.f32.partialorder %v2535_v11, 0.0 }
 0x11e   :  { %1084 = vmatpush1.msra.mxu0 %v755_v17  ;;  %1197 = vmatpush1.msra.mxu1 %v757_v63  ;;  %vm598_vm11 = vcmp.gt.f32.partialorder %v2544_v56, 0.0  ;;  %vm595_vm12 = vcmp.gt.f32.partialorder %v2514_v16, 0.0  ;;  %vm597_vm5 = vcmp.gt.f32.partialorder %v2525_v13, 0.0  ;;  %v731_v58 = vsel %vm603_vm6, %v2558_v7, %v667_v57 }
 0x11f   :  { %1085 = vmatprep.subr.mxu0 %v748_v38  ;;  %1198 = vmatprep.subr.mxu1 %v750_v12  ;;  %v733_v6 = vsel %vm605_vm13, %v2567_v5, %v669_v51  ;;  %v636_v47 = vmul.f32 0.01, %v2416_v36  ;;  %v638_v26 = vmul.f32 0.01, %v2422_v21  ;;  %vm588_vm2 = vcmp.gt.f32.partialorder %v2492_v22, 0.0 }
 0x120   :  { %935 = vmatprep.mubr.f32.mxu0 %v3517_v1  ;;  %1048 = vmatprep.mubr.f32.mxu1 %v3517_v1  ;;  %vm590_vm1 = vcmp.gt.f32.partialorder %v2503_v18, 0.0  ;;  %v651_v45 = vmul.f32 0.01, %v2470_v27  ;;  %v653_v23 = vmul.f32 0.01, %v2481_v24  ;;  %v724_v7 = vsel %vm596_vm9, %v2535_v11, %v660_v55 }
 0x121   :  { %1086 = vmatpush1.msra.mxu0 %v747_v8  ;;  %1199 = vmatpush1.msra.mxu1 %v749_v33  ;;  %v726_v5 = vsel %vm598_vm11, %v2544_v56, %v662_v50  ;;  %vm587_vm3 = vcmp.gt.f32.partialorder %v2470_v27, 0.0  ;;  %vm589_vm7 = vcmp.gt.f32.partialorder %v2481_v24, 0.0  ;;  %v723_v60 = vsel %vm595_vm12, %v2514_v16, %v659_v3  ;;  %v2747_v16 = vld [vmem:[%s3471_s2 + $0x38] sm:$0xff] }
 0x122   :  { %1974 = vmatmul.mubr.msk.f32.gmra.mxu0 %vm816_vm0, %v2647_v9  ;;  %1982 = vmatmul.mubr.msk.f32.gmra.mxu1 %vm816_vm0, %v2647_v9  ;;  %v725_v43 = vsel %vm597_vm5, %v2525_v13, %v661_v28  ;;  %v644_v11 = vmul.f32 0.01, %v2448_v52  ;;  %v646_v19 = vmul.f32 0.01, %v2459_v29  ;;  %v716_v56 = vsel %vm588_vm2, %v2492_v22, %v652_v31 }
 0x123   :  { %1087 = vmatprep.subr.mxu0 %v740_v53  ;;  %1200 = vmatprep.subr.mxu1 %v742_v44  ;;  %v718_v61 = vsel %vm590_vm1, %v2503_v18, %v654_v54  ;;  %v643_v13 = vmul.f32 0.01, %v2429_v49  ;;  %v645_v42 = vmul.f32 0.01, %v2438_v40  ;;  %vm580_vm4 = vcmp.gt.f32.partialorder %v2448_v52, 0.0 }
 0x124   :  { %1088 = vmatpush1.msra.mxu0 %v739_v39  ;;  %1201 = vmatpush1.msra.mxu1 %v741_v30  ;;  %vm582_vm10 = vcmp.gt.f32.partialorder %v2459_v29, 0.0  ;;  %vm579_vm14 = vcmp.gt.f32.partialorder %v2429_v49, 0.0  ;;  %vm581_vm15 = vcmp.gt.f32.partialorder %v2438_v40, 0.0  ;;  %v715_v22 = vsel %vm587_vm3, %v2470_v27, %v651_v45 }
 0x125   :  { %1089 = vmatprep.subr.mxu0 %v732_v46  ;;  %1202 = vmatprep.subr.mxu1 %v734_v25  ;;  %v717_v18 = vsel %vm589_vm7, %v2481_v24, %v653_v23  ;;  %v635_v17 = vmul.f32 0.01, %v2406_v62  ;;  %vm572_vm8 = vcmp.gt.f32.partialorder %v2416_v36, 0.0  ;;  %vm574_vm6 = vcmp.gt.f32.partialorder %v2422_v21, 0.0 }
 0x126   :  { %941 = vmatprep.mubr.f32.mxu0 %v3517_v1  ;;  %1054 = vmatprep.mubr.f32.mxu1 %v3517_v1  ;;  %vm571_vm13 = vcmp.gt.f32.partialorder %v2406_v62, 0.0  ;;  %v637_v63 = vmul.f32 0.01, %v2411_v2  ;;  %v708_v27 = vsel %vm580_vm4, %v2448_v52, %v644_v11  ;;  %v710_v24 = vsel %vm582_vm10, %v2459_v29, %v646_v19 }
 0x127   :  { %1090 = vmatpush1.msra.mxu0 %v731_v58  ;;  %1203 = vmatpush1.msra.mxu1 %v733_v6  ;;  %vm573_vm9 = vcmp.gt.f32.partialorder %v2411_v2, 0.0  ;;  %v707_v41 = vsel %vm579_vm14, %v2429_v49, %v643_v13  ;;  %v709_v14 = vsel %vm581_vm15, %v2438_v40, %v645_v42  ;;  %v700_v52 = vsel %vm572_vm8, %v2416_v36, %v636_v47 }
 0x128   :  { %1975 = vmatmul.mubr.msk.f32.gmra.mxu0 %vm816_vm0, %v2696_v4  ;;  %1983 = vmatmul.mubr.msk.f32.gmra.mxu1 %vm816_vm0, %v2696_v4  ;;  %v702_v29 = vsel %vm574_vm6, %v2422_v21, %v638_v26  ;;  %v699_v49 = vsel %vm571_vm13, %v2406_v62, %v635_v17  ;;  %v701_v40 = vsel %vm573_vm9, %v2411_v2, %v637_v63  ;;  %v2080_v21 = vmov 1   ;;  %v2846_v2 = vpop.permute.xlu1 %803 }
 0x129   :  { %1091 = vmatprep.subr.mxu0 %v724_v7  ;;  %1204 = vmatprep.subr.mxu1 %v726_v5  ;;  %3518 = vst [vmem:[#allocation16_spill] sm:$0xff] %v2846_v2 }
 0x12a   :  { %1092 = vmatpush1.msra.mxu0 %v723_v60  ;;  %1205 = vmatpush1.msra.mxu1 %v725_v43 }
 0x12b   :  { %1093 = vmatprep.subr.mxu0 %v716_v56  ;;  %1206 = vmatprep.subr.mxu1 %v718_v61 }
 0x12c   :  { %947 = vmatprep.mubr.f32.mxu0 %v3517_v1  ;;  %1060 = vmatprep.mubr.f32.mxu1 %v3517_v1 }
 0x12d   :  { %1094 = vmatpush1.msra.mxu0 %v715_v22  ;;  %1207 = vmatpush1.msra.mxu1 %v717_v18 }
 0x12e   :  { %1976 = vmatmul.mubr.msk.f32.gmra.mxu0 %vm816_vm0, %v2747_v16  ;;  %1984 = vmatmul.mubr.msk.f32.gmra.mxu1 %vm816_vm0, %v2747_v16 }
 0x12f   :  { %1095 = vmatprep.subr.mxu0 %v708_v27  ;;  %1208 = vmatprep.subr.mxu1 %v710_v24 }
 0x130   :  { %1096 = vmatpush1.msra.mxu0 %v707_v41  ;;  %1209 = vmatpush1.msra.mxu1 %v709_v14 }
 0x131   :  { %1097 = vmatprep.subr.mxu0 %v700_v52  ;;  %1210 = vmatprep.subr.mxu1 %v702_v29 }
 0x132   :  { %1098 = vmatpush1.msra.mxu0 %v699_v49  ;;  %1131 = vmatprep.mubr.f32.mxu0 %v3517_v1 }
 0x133   :  { %1211 = vmatpush1.msra.mxu1 %v701_v40  ;;  %1244 = vmatprep.mubr.f32.mxu1 %v3517_v1 }
 0x134   :  { %1985 = vmatmul.mubr.msk.f32.vlgmr.msra.gmra.mxu0 %vm816_vm0, %v2556_v10  ;;  %1993 = vmatmul.mubr.msk.f32.vlgmr.msra.gmra.mxu1 %vm816_vm0, %v2556_v10 }
 0x135   :  { %1137 = vmatprep.mubr.f32.mxu0 %v3517_v1  ;;  %1250 = vmatprep.mubr.f32.mxu1 %v3517_v1 }
 0x136   :  { %2024 = vset.pattern.permute.xlu0 %v2080_v21 }
 0x137   :  { %1486 = vperm.xlu0 %2024, %v2306_v0  }
 0x138   :  { %1986 = vmatmul.mubr.msk.f32.gmra.mxu0 %vm816_vm0, %v2584_v32  ;;  %1994 = vmatmul.mubr.msk.f32.gmra.mxu1 %vm816_vm0, %v2584_v32 }
 0x139   :  { %1143 = vmatprep.mubr.f32.mxu0 %v3517_v1  ;;  %1256 = vmatprep.mubr.f32.mxu1 %v3517_v1 }
 0x13c   :  { %1987 = vmatmul.mubr.msk.f32.gmra.mxu0 %vm816_vm0, %v2603_v48  ;;  %1995 = vmatmul.mubr.msk.f32.gmra.mxu1 %vm816_vm0, %v2603_v48  ;;  %v2848_v48 = vpop.permute.xlu0 %813 }
 0x13d   :  { %1149 = vmatprep.mubr.f32.mxu0 %v3517_v1  ;;  %1262 = vmatprep.mubr.f32.mxu1 %v3517_v1  ;;  %3519 = vst [vmem:[#allocation17_spill] sm:$0xff] %v2848_v48 }
 0x140   :  { %1988 = vmatmul.mubr.msk.f32.gmra.mxu0 %vm816_vm0, %v2616_v34  ;;  %1996 = vmatmul.mubr.msk.f32.gmra.mxu1 %vm816_vm0, %v2616_v34  ;;  %v2852_v8 = vpop.permute.xlu0 %808 }
 0x141   :  { %1155 = vmatprep.mubr.f32.mxu0 %v3517_v1  ;;  %1268 = vmatprep.mubr.f32.mxu1 %v3517_v1  ;;  %3521 = vst [vmem:[#allocation19_spill] sm:$0xff] %v2852_v8 }
 0x144   :  { %1989 = vmatmul.mubr.msk.f32.gmra.mxu0 %vm816_vm0, %v2627_v59  ;;  %1997 = vmatmul.mubr.msk.f32.gmra.mxu1 %vm816_vm0, %v2627_v59  ;;  %v2856_v44 = vpop.permute.xlu0 %793 }
 0x145   :  { %1161 = vmatprep.mubr.f32.mxu0 %v3517_v1  ;;  %1274 = vmatprep.mubr.f32.mxu1 %v3517_v1  ;;  %3523 = vst [vmem:[#allocation21_spill] sm:$0xff] %v2856_v44 }
 0x148   :  { %1990 = vmatmul.mubr.msk.f32.gmra.mxu0 %vm816_vm0, %v2647_v9  ;;  %1998 = vmatmul.mubr.msk.f32.gmra.mxu1 %vm816_vm0, %v2647_v9  ;;  %v2850_v9 = vpop.permute.xlu1 %798  ;;  %v2860_v25 = vpop.permute.xlu0 %783 }
 0x149   :  { %1167 = vmatprep.mubr.f32.mxu0 %v3517_v1  ;;  %1280 = vmatprep.mubr.f32.mxu1 %v3517_v1  ;;  %3520 = vst [vmem:[#allocation18_spill] sm:$0xff] %v2850_v9  ;;  %3525 = vst [vmem:[#allocation23_spill] sm:$0xff] %v2860_v25 }
 0x14c   :  { %1991 = vmatmul.mubr.msk.f32.gmra.mxu0 %vm816_vm0, %v2696_v4  ;;  %1999 = vmatmul.mubr.msk.f32.gmra.mxu1 %vm816_vm0, %v2696_v4  ;;  %v2854_v54 = vpop.permute.xlu1 %788 }
 0x14d   :  { %1173 = vmatprep.mubr.f32.mxu0 %v3517_v1  ;;  %1286 = vmatprep.mubr.f32.mxu1 %v3517_v1  ;;  %3522 = vst [vmem:[#allocation20_spill] sm:$0xff] %v2854_v54 }
 0x150   :  { %1992 = vmatmul.mubr.msk.f32.gmra.mxu0 %vm816_vm0, %v2747_v16  ;;  %2000 = vmatmul.mubr.msk.f32.gmra.mxu1 %vm816_vm0, %v2747_v16  ;;  %v2858_v50 = vpop.permute.xlu1 %778 }
 0x151   :  { %1556 = vmatprep.mubr.f32.mxu0 %v3517_v1  ;;  %1627 = vmatprep.mubr.f32.mxu1 %v3517_v1  ;;  %3524 = vst [vmem:[#allocation22_spill] sm:$0xff] %v2858_v50 }
 0x1cc   :  { %v907_v36 = vpop.f32.mrf.mxu0  ;;  %v1020_v62 = vpop.f32.mrf.mxu1 }
 0x1cd   :  { %v2863_v28 = vadd.f32 %v907_v36, %v2858_v50  ;;  %v2869_v6 = vadd.f32 %v1020_v62, %v2858_v50 }
 0x1ce   :  { %v909_v10 = vpop.f32.mrf.mxu0  ;;  %v1022_v32 = vpop.f32.mrf.mxu1 }
 0x1cf   :  { %v2866_v58 = vadd.f32 %v909_v10, %v2858_v50  ;;  %3526 = vst [vmem:[#allocation24_spill] sm:$0xff] %v2869_v6  ;;  %v2878_v7 = vadd.f32 %v1022_v32, %v2858_v50  ;;  %v2893_v19 = vmul.f32 0.01, %v2863_v28  ;;  %v2905_v13 = vmul.f32 0.01, %v2869_v6 }
 0x1d0   :  { %v913_v34 = vpop.f32.mrf.mxu0  ;;  %v1026_v59 = vpop.f32.mrf.mxu1  ;;  %vm1293_vm6 = vcmp.gt.f32.partialorder %v2863_v28, 0.0 }
 0x1d1   :  { %v2872_v45 = vadd.f32 %v913_v34, %v2860_v25  ;;  %v2875_v23 = vadd.f32 %v1026_v59, %v2860_v25  ;;  %3527 = vst [vmem:[#allocation25_spill] sm:$0xff] %v2893_v19  ;;  %v2902_v16 = vmul.f32 0.01, %v2866_v58  ;;  %3529 = vst [vmem:[#allocation27_spill] sm:$0xff] %v2905_v13  ;;  %v2917_v27 = vmul.f32 0.01, %v2878_v7 }
 0x1d2   :  { %v915_v38 = vpop.f32.mrf.mxu0  ;;  %v1028_v12 = vpop.f32.mrf.mxu1 }
 0x1d3   :  { %v2881_v5 = vadd.f32 %v915_v38, %v2860_v25  ;;  %v2884_v60 = vadd.f32 %v1028_v12, %v2860_v25  ;;  %3528 = vst [vmem:[#allocation26_spill] sm:$0xff] %v2902_v16  ;;  %v2911_v17 = vmul.f32 0.01, %v2872_v45  ;;  %v2914_v63 = vmul.f32 0.01, %v2875_v23  ;;  %3532 = vst [vmem:[#allocation30_spill] sm:$0xff] %v2917_v27 }
 0x1d4   :  { %v919_v37 = vpop.f32.mrf.mxu0  ;;  %v1032_v35 = vpop.f32.mrf.mxu1 }
 0x1d5   :  { %v2887_v43 = vadd.f32 %v919_v37, %v2854_v54  ;;  %v2890_v11 = vadd.f32 %v1032_v35, %v2854_v54  ;;  %3530 = vst [vmem:[#allocation28_spill] sm:$0xff] %v2911_v17  ;;  %3531 = vst [vmem:[#allocation29_spill] sm:$0xff] %v2914_v63  ;;  %v2926_v14 = vmul.f32 0.01, %v2881_v5  ;;  %v2929_v52 = vmul.f32 0.01, %v2884_v60 }
 0x1d6   :  { %v921_v33 = vpop.f32.mrf.mxu0  ;;  %v1034_v0 = vpop.f32.mrf.mxu1 }
 0x1d7   :  { %v2896_v56 = vadd.f32 %v921_v33, %v2854_v54  ;;  %v2899_v61 = vadd.f32 %v1034_v0, %v2854_v54  ;;  %v2938_v36 = vmul.f32 0.01, %v2887_v43  ;;  %v2941_v62 = vmul.f32 0.01, %v2890_v11 }
 0x1d8   :  { %v925_v31 = vpop.f32.mrf.mxu0  ;;  %v1038_v57 = vpop.f32.mrf.mxu1 }
 0x1d9   :  { %v2908_v18 = vadd.f32 %v925_v31, %v2856_v44  ;;  %v2923_v41 = vadd.f32 %v1038_v57, %v2856_v44  ;;  %v2950_v34 = vmul.f32 0.01, %v2896_v56  ;;  %v2953_v59 = vmul.f32 0.01, %v2899_v61 }
 0x1da   :  { %v927_v51 = vpop.f32.mrf.mxu0  ;;  %v1040_v53 = vpop.f32.mrf.mxu1 }
 0x1db   :  { %v2920_v24 = vadd.f32 %v927_v51, %v2856_v44  ;;  %v2935_v21 = vadd.f32 %v1040_v53, %v2856_v44  ;;  %v2965_v35 = vmul.f32 0.01, %v2908_v18  ;;  %v2977_v57 = vmul.f32 0.01, %v2923_v41 }
 0x1dc   :  { %v931_v39 = vpop.f32.mrf.mxu0 }
 0x1dd   :  { %v1044_v30 = vpop.f32.mrf.mxu1  ;;  %v2932_v29 = vadd.f32 %v931_v39, %v2850_v9  ;;  %v2974_v31 = vmul.f32 0.01, %v2920_v24 }
 0x1de   :  { %v933_v55 = vpop.f32.mrf.mxu0  ;;  %v2944_v10 = vadd.f32 %v1044_v30, %v2850_v9 }
 0x1df   :  { %v1046_v46 = vpop.f32.mrf.mxu1  ;;  %v2947_v32 = vadd.f32 %v933_v55, %v2850_v9  ;;  %v2980_v51 = vmul.f32 0.01, %v2932_v29 }
 0x1e0   :  { %v2956_v38 = vadd.f32 %v1046_v46, %v2850_v9  ;;  %v2985_v46 = vmul.f32 0.01, %v2935_v21 }
 0x1e1   :  { %vm1326_vm13 = vcmp.gt.f32.partialorder %v2947_v32, 0.0 }
 0x1e2   :  { %v937_v4 = vpop.f32.mrf.mxu0  ;;  %v1050_v3 = vpop.f32.mrf.mxu1  ;;  %v2996_v20 = vmul.f32 0.01, %v2956_v38  ;;  %vm1328_vm9 = vcmp.gt.f32.partialorder %v2956_v38, 0.0 }
 0x1e3   :  { %v2959_v12 = vadd.f32 %v937_v4, %v2846_v2  ;;  %v2962_v37 = vadd.f32 %v1050_v3, %v2846_v2  ;;  %v2988_v4 = vmul.f32 0.01, %v2944_v10  ;;  %v2991_v3 = vmul.f32 0.01, %v2947_v32 }
 0x1e4   :  { %v939_v47 = vpop.f32.mrf.mxu0  ;;  %v1052_v26 = vpop.f32.mrf.mxu1 }
 0x1e5   :  { %v2968_v33 = vadd.f32 %v939_v47, %v2846_v2  ;;  %v2971_v0 = vadd.f32 %v1052_v26, %v2846_v2  ;;  %vm1333_vm15 = vcmp.gt.f32.partialorder %v2959_v12, 0.0  ;;  %vm1335_vm8 = vcmp.gt.f32.partialorder %v2962_v37, 0.0 }
 0x1e7   :  { %v1398_v9 = vmul.f32 0.01, %v2968_v33  ;;  %v1400_v44 = vmul.f32 0.01, %v2971_v0  ;;  %vm1334_vm10 = vcmp.gt.f32.partialorder %v2968_v33, 0.0  ;;  %vm1336_vm14 = vcmp.gt.f32.partialorder %v2971_v0, 0.0 }
 0x1e8   :  { %v943_v42 = vpop.f32.mrf.mxu0  ;;  %v1056_v22 = vpop.f32.mrf.mxu1 }
 0x1e9   :  { %v944_v1 = vadd.f32 %v943_v42, %v2852_v8 }
 0x1ea   :  { %v945_v49 = vpop.f32.mrf.mxu0  ;;  %v1058_v40 = vpop.f32.mrf.mxu1 }
 0x1eb   :  { %v946_v53 = vadd.f32 %v945_v49, %v2852_v8  ;;  %v1059_v39 = vadd.f32 %v1058_v40, %v2852_v8  ;;  %v2999_v49 = vmul.f32 0.01, %v2959_v12  ;;  %v3002_v40 = vmul.f32 0.01, %v2962_v37 }
 0x1ec   :  { %v1405_v42 = vmul.f32 0.01, %v944_v1  ;;  %vm1341_vm7 = vcmp.gt.f32.partialorder %v944_v1, 0.0 }
 0x1ed   :  { %v1408_v54 = vmul.f32 0.01, %v1059_v39  ;;  %vm1342_vm1 = vcmp.gt.f32.partialorder %v946_v53, 0.0  ;;  %vm1344_vm3 = vcmp.gt.f32.partialorder %v1059_v39, 0.0 }
 0x1ee   :  { %v949_v30 = vpop.f32.mrf.mxu0  ;;  %v1062_v55 = vpop.f32.mrf.mxu1 }
 0x1ef   :  { %v950_v47 = vadd.f32 %v949_v30, %v2848_v48  ;;  %v1063_v26 = vadd.f32 %v1062_v55, %v2848_v48  ;;  %v1057_v30 = vadd.f32 %v1056_v22, %v2852_v8  ;;  %v1406_v55 = vmul.f32 0.01, %v946_v53 }
 0x1f0   :  { %v951_v15 = vpop.f32.mrf.mxu0  ;;  %v1064_v2 = vpop.f32.mrf.mxu1 }
 0x1f1   :  { %v952_v25 = vadd.f32 %v951_v15, %v2848_v48  ;;  %v1065_v13 = vadd.f32 %v1064_v2, %v2848_v48  ;;  %vm1349_vm11 = vcmp.gt.f32.partialorder %v950_v47, 0.0  ;;  %v1413_v27 = vmul.f32 0.01, %v950_v47 }
 0x1f2   :  { %vm1351_vm12 = vcmp.gt.f32.partialorder %v1063_v26, 0.0  ;;  %v1415_v16 = vmul.f32 0.01, %v1063_v26  ;;  %v1407_v22 = vmul.f32 0.01, %v1057_v30  ;;  %vm1343_vm4 = vcmp.gt.f32.partialorder %v1057_v30, 0.0 }
 0x1f3   :  { %v1414_v50 = vmul.f32 0.01, %v952_v25  ;;  %v1416_v19 = vmul.f32 0.01, %v1065_v13  ;;  %vm1350_vm5 = vcmp.gt.f32.partialorder %v952_v25, 0.0  ;;  %vm1352_vm2 = vcmp.gt.f32.partialorder %v1065_v13, 0.0 }
 0x1f4   :  { %v3010_v63 = vpop.f32.mrf.mxu0  ;;  %v3012_v17 = vpop.f32.mrf.mxu1 }
 0x1f5   :  { %3533 = vst [vmem:[#allocation31_spill] sm:$0xff] %v3010_v63  ;;  %3534 = vst [vmem:[#allocation32_spill] sm:$0xff] %v3012_v17  ;;  %v1478_v48 = vsel %vm1350_vm5, %v952_v25, %v1414_v50  ;;  %v1480_v8 = vsel %vm1352_vm2, %v1065_v13, %v1416_v19  ;;  %v1477_v63 = vsel %vm1349_vm11, %v950_v47, %v1413_v27  ;;  %vm1325_vm11 = vcmp.gt.f32.partialorder %v2932_v29, 0.0 }
 0x1f6   :  { %v3014_v15 = vpop.f32.mrf.mxu0  ;;  %v3016_v2 = vpop.f32.mrf.mxu1  ;;  %1508 = vmatprep.subr.mxu0 %v1478_v48  ;;  %1579 = vmatprep.subr.mxu1 %v1480_v8  ;;  %v1479_v17 = vsel %vm1351_vm12, %v1063_v26, %v1415_v16  ;;  %v1470_v48 = vsel %vm1342_vm1, %v946_v53, %v1406_v55  ;;  %v1472_v8 = vsel %vm1344_vm3, %v1059_v39, %v1408_v54  ;;  %vm1327_vm12 = vcmp.gt.f32.partialorder %v2944_v10, 0.0  ;;  %v3542_v39 = vld [vmem:[#allocation26_spill] sm:$0xff] }
 0x1f7   :  { %3535 = vst [vmem:[#allocation33_spill] sm:$0xff] %v3014_v15  ;;  %1509 = vmatpush1.msra.mxu0 %v1477_v63  ;;  %1580 = vmatpush1.msra.mxu1 %v1479_v17  ;;  %v1469_v50 = vsel %vm1341_vm7, %v944_v1, %v1405_v42  ;;  %v1471_v25 = vsel %vm1343_vm4, %v1057_v30, %v1407_v22  ;;  %vm1318_vm5 = vcmp.gt.f32.partialorder %v2920_v24, 0.0  ;;  %vm1320_vm2 = vcmp.gt.f32.partialorder %v2935_v21, 0.0 }
 0x1f8   :  { %v3024_v6 = vpop.f32.mrf.mxu0  ;;  %v3026_v15 = vpop.f32.mrf.mxu1  ;;  %1510 = vmatprep.subr.mxu0 %v1470_v48  ;;  %1581 = vmatprep.subr.mxu1 %v1472_v8  ;;  %v1462_v1 = vsel %vm1334_vm10, %v2968_v33, %v1398_v9  ;;  %v1464_v54 = vsel %vm1336_vm14, %v2971_v0, %v1400_v44  ;;  %v1461_v13 = vsel %vm1333_vm15, %v2959_v12, %v2999_v49  ;;  %vm1317_vm1 = vcmp.gt.f32.partialorder %v2908_v18, 0.0  ;;  %v3538_v0 = vld [vmem:[#allocation29_spill] sm:$0xff] }
 0x1f9   :  { %1511 = vmatpush1.msra.mxu0 %v1469_v50  ;;  %1582 = vmatpush1.msra.mxu1 %v1471_v25  ;;  %v1463_v17 = vsel %vm1335_vm8, %v2962_v37, %v3002_v40  ;;  %v1454_v44 = vsel %vm1326_vm13, %v2947_v32, %v2991_v3  ;;  %v1456_v27 = vsel %vm1328_vm9, %v2956_v38, %v2996_v20  ;;  %vm1319_vm3 = vcmp.gt.f32.partialorder %v2923_v41, 0.0  ;;  %v3548_v40 = vld [vmem:[#allocation23_spill] sm:$0xff] }
 0x1fa   :  { %v3037_v19 = vpop.f32.mrf.mxu0  ;;  %v3039_v16 = vpop.f32.mrf.mxu1  ;;  %1512 = vmatprep.subr.mxu0 %v1462_v1  ;;  %1583 = vmatprep.subr.mxu1 %v1464_v54  ;;  %v1453_v12 = vsel %vm1325_vm11, %v2932_v29, %v2980_v51  ;;  %v1455_v32 = vsel %vm1327_vm12, %v2944_v10, %v2988_v4  ;;  %vm1310_vm7 = vcmp.gt.f32.partialorder %v2896_v56, 0.0  ;;  %vm1312_vm4 = vcmp.gt.f32.partialorder %v2899_v61, 0.0 }
 0x1fb   :  { %1513 = vmatpush1.msra.mxu0 %v1461_v13  ;;  %1584 = vmatpush1.msra.mxu1 %v1463_v17  ;;  %v1446_v29 = vsel %vm1318_vm5, %v2920_v24, %v2974_v31  ;;  %v1448_v10 = vsel %vm1320_vm2, %v2935_v21, %v2985_v46  ;;  %vm1309_vm10 = vcmp.gt.f32.partialorder %v2887_v43, 0.0  ;;  %vm1311_vm14 = vcmp.gt.f32.partialorder %v2890_v11, 0.0  ;;  %v3543_v46 = vld [vmem:[#allocation30_spill] sm:$0xff] }
 0x1fc   :  { %v3057_v9 = vpop.f32.mrf.mxu0  ;;  %v3059_v63 = vpop.f32.mrf.mxu1  ;;  %1514 = vmatprep.subr.mxu0 %v1454_v44  ;;  %1585 = vmatprep.subr.mxu1 %v1456_v27  ;;  %v1445_v37 = vsel %vm1317_vm1, %v2908_v18, %v2965_v35  ;;  %v1447_v24 = vsel %vm1319_vm3, %v2923_v41, %v2977_v57  ;;  %vm1302_vm15 = vcmp.gt.f32.partialorder %v2881_v5, 0.0  ;;  %vm1304_vm8 = vcmp.gt.f32.partialorder %v2884_v60, 0.0  ;;  %v3545_v4 = vld [vmem:[#allocation32_spill] sm:$0xff]  ;;  %v3557_v27 = vld [vmem:[#allocation21_spill] sm:$0xff] }
 0x1fd   :  { %1515 = vmatpush1.msra.mxu0 %v1453_v12  ;;  %1586 = vmatpush1.msra.mxu1 %v1455_v32  ;;  %v1438_v18 = vsel %vm1310_vm7, %v2896_v56, %v2950_v34  ;;  %v1440_v41 = vsel %vm1312_vm4, %v2899_v61, %v2953_v59  ;;  %vm1301_vm13 = vcmp.gt.f32.partialorder %v2872_v45, 0.0  ;;  %vm1303_vm9 = vcmp.gt.f32.partialorder %v2875_v23, 0.0 }
 0x1fe   :  { %v3081_v20 = vpop.f32.mrf.mxu0  ;;  %v3083_v38 = vpop.f32.mrf.mxu1  ;;  %1516 = vmatprep.subr.mxu0 %v1446_v29  ;;  %1587 = vmatprep.subr.mxu1 %v1448_v10  ;;  %v1437_v35 = vsel %vm1309_vm10, %v2887_v43, %v2938_v36  ;;  %v1439_v56 = vsel %vm1311_vm14, %v2890_v11, %v2941_v62  ;;  %vm1294_vm11 = vcmp.gt.f32.partialorder %v2866_v58, 0.0  ;;  %vm1296_vm12 = vcmp.gt.f32.partialorder %v2878_v7, 0.0  ;;  %v3536_v36 = vld [vmem:[#allocation24_spill] sm:$0xff]  ;;  %v3546_v47 = vld [vmem:[#allocation33_spill] sm:$0xff] }
 0x1ff   :  { %1517 = vmatpush1.msra.mxu0 %v1445_v37  ;;  %1588 = vmatpush1.msra.mxu1 %v1447_v24  ;;  %v1430_v59 = vsel %vm1302_vm15, %v2881_v5, %v2926_v14  ;;  %v1432_v43 = vsel %vm1304_vm8, %v2884_v60, %v2929_v52  ;;  %vm1295_vm5 = vcmp.gt.f32.partialorder %v3536_v36, 0.0  ;;  %v3537_v11 = vld [vmem:[#allocation28_spill] sm:$0xff]  ;;  %v1431_v31 = vsel %vm1303_vm9, %v2875_v23, %v3538_v0  ;;  %v3539_v5 = vld [vmem:[#allocation25_spill] sm:$0xff]  ;;  %v3540_v60 = vld [vmem:[#allocation22_spill] sm:$0xff] }
 0x200   :  { %v3105_v21 = vpop.f32.mrf.mxu0  ;;  %v3107_v33 = vpop.f32.mrf.mxu1  ;;  %1518 = vmatprep.subr.mxu0 %v1438_v18  ;;  %1589 = vmatprep.subr.mxu1 %v1440_v41  ;;  %v1429_v62 = vsel %vm1301_vm13, %v2872_v45, %v3537_v11  ;;  %v1421_v14 = vsel %vm1293_vm6, %v2863_v28, %v3539_v5  ;;  %v3541_v52 = vld [vmem:[#allocation31_spill] sm:$0xff]  ;;  %v1422_v45 = vsel %vm1294_vm11, %v2866_v58, %v3542_v39  ;;  %v3558_v41 = vld [vmem:[#allocation18_spill] sm:$0xff] }
 0x201   :  { %1519 = vmatpush1.msra.mxu0 %v1437_v35  ;;  %1590 = vmatpush1.msra.mxu1 %v1439_v56  ;;  %v3152_v57 = vadd.f32 %v3541_v52, %v3540_v60  ;;  %v1424_v23 = vsel %vm1296_vm12, %v2878_v7, %v3543_v46  ;;  %v3165_v28 = vld [vmem:[%s3471_s2 + $0x40] sm:$0xff]  ;;  %v3169_v3 = vadd.f32 %v3545_v4, %v3540_v60  ;;  %s2013_s2 = sld [smem:[#allocation2 + $0x1]] }
 0x202   :  { %v1153_v61 = vpop.f32.mrf.mxu0  ;;  %v1266_v34 = vpop.f32.mrf.mxu1  ;;  %1520 = vmatprep.subr.mxu0 %v1430_v59  ;;  %1591 = vmatprep.subr.mxu1 %v1432_v43  ;;  %3544 = vst [vmem:[#allocation24_spill] sm:$0xff] %v3165_v28  ;;  %v3173_v26 = vadd.f32 %v3546_v47, %v3540_v60  ;;  %v3547_v58 = vld [vmem:[#allocation27_spill] sm:$0xff]  ;;  %v3181_v49 = vadd.f32 %v3016_v2, %v3540_v60 }
 0x203   :  { %1521 = vmatpush1.msra.mxu0 %v1429_v62  ;;  %1592 = vmatpush1.msra.mxu1 %v1431_v31  ;;  %v1423_v7 = vsel %vm1295_vm5, %v3536_v36, %v3547_v58  ;;  %v3185_v30 = vadd.f32 %v3024_v6, %v3548_v40  ;;  %v3189_v55 = vadd.f32 %v3026_v15, %v3548_v40  ;;  %v3204_v6 = vmul.f32 0.01, %v3152_v57  ;;  %v3550_v15 = vld [vmem:[#allocation20_spill] sm:$0xff]  ;;  %v3560_v46 = vld [vmem:[#allocation19_spill] sm:$0xff] }
 0x204   :  { %v1157_v51 = vpop.f32.mrf.mxu0  ;;  %v1270_v53 = vpop.f32.mrf.mxu1  ;;  %1522 = vmatprep.subr.mxu0 %v1422_v45  ;;  %1593 = vmatprep.subr.mxu1 %v1424_v23  ;;  %v3193_v48 = vadd.f32 %v3037_v19, %v3548_v40  ;;  %v3197_v2 = vadd.f32 %v3039_v16, %v3548_v40  ;;  %v3208_v8 = vadd.f32 %v3057_v9, %v3550_v15  ;;  %v3551_v16 = vmov 0.0   ;;  %v3559_v62 = vld [vmem:[#allocation16_spill] sm:$0xff] }
 0x205   :  { %1523 = vmatpush1.msra.mxu0 %v1421_v14  ;;  %1594 = vmatpush1.msra.mxu1 %v1423_v7  ;;  %3549 = vst [vmem:[#allocation28_spill] sm:$0xff] %v3204_v6  ;;  %v3212_v50 = vadd.f32 %v3059_v63, %v3550_v15  ;;  %v3216_v1 = vmul.f32 0.01, %v3169_v3  ;;  %v3219_v54 = vmul.f32 0.01, %v3173_v26  ;;  %v3223_v13 = vadd.f32 %v3081_v20, %v3550_v15 }
 0x206   :  { %v1159_v42 = vpop.f32.mrf.mxu0  ;;  %v1272_v22 = vpop.f32.mrf.mxu1  ;;  %2001 = vmatmul.mubr.msk.f32.vlgmr.msra.gmra.mxu0 %vm816_vm0, %v3165_v28  ;;  %2002 = vmatmul.mubr.msk.f32.vlgmr.msra.gmra.mxu1 %vm816_vm0, %v3165_v28  ;;  %v3227_v17 = vadd.f32 %v3083_v38, %v3550_v15  ;;  %v3231_v9 = vmul.f32 0.01, %v3181_v49  ;;  %v3234_v63 = vmul.f32 0.01, %v3185_v30  ;;  %v3237_v44 = vmul.f32 0.01, %v3189_v55 }
 0x207   :  { %1698 = vmatprep.mubr.f32.mxu0 %v3551_v16  ;;  %3552 = vst [vmem:[#allocation29_spill] sm:$0xff] %v3216_v1  ;;  %3553 = vst [vmem:[#allocation25_spill] sm:$0xff] %v3219_v54  ;;  %1769 = vmatprep.mubr.f32.mxu1 %v3551_v16  ;;  %v3241_v12 = vadd.f32 %v3105_v21, %v3557_v27  ;;  %v3244_v38 = vmul.f32 0.01, %v3193_v48  ;;  %v3247_v29 = vmul.f32 0.01, %v3197_v2 }
 0x208   :  { %v1163_v25 = vpop.f32.mrf.mxu0  ;;  %v1276_v19 = vpop.f32.mrf.mxu1  ;;  %3554 = vst [vmem:[#allocation22_spill] sm:$0xff] %v3231_v9  ;;  %3555 = vst [vmem:[#allocation31_spill] sm:$0xff] %v3234_v63  ;;  %v3251_v10 = vadd.f32 %v3107_v33, %v3557_v27  ;;  %v3254_v37 = vadd.f32 %v1153_v61, %v3557_v27  ;;  %v3257_v24 = vmul.f32 0.01, %v3208_v8  ;;  %v3260_v21 = vmul.f32 0.01, %v3212_v50 }
 0x209   :  { %3556 = vst [vmem:[#allocation26_spill] sm:$0xff] %v3237_v44  ;;  %v3263_v18 = vadd.f32 %v1266_v34, %v3557_v27  ;;  %v3266_v35 = vadd.f32 %v1157_v51, %v3558_v41  ;;  %v3269_v33 = vmul.f32 0.01, %v3223_v13  ;;  %v3272_v61 = vmul.f32 0.01, %v3227_v17 }
 0x20a   :  { %v1165_v32 = vpop.f32.mrf.mxu0  ;;  %v1278_v20 = vpop.f32.mrf.mxu1  ;;  %v3275_v43 = vadd.f32 %v1270_v53, %v3558_v41  ;;  %v3278_v36 = vadd.f32 %v1159_v42, %v3558_v41  ;;  %v3281_v34 = vmul.f32 0.01, %v3241_v12  ;;  %v3284_v11 = vadd.f32 %v1272_v22, %v3558_v41  ;;  %v3561_v42 = vld [vmem:[#allocation17_spill] sm:$0xff] }
 0x20b   :  { %v3287_v0 = vadd.f32 %v1163_v25, %v3559_v62  ;;  %v3290_v31 = vadd.f32 %v1276_v19, %v3559_v62  ;;  %v3293_v60 = vmul.f32 0.01, %v3251_v10  ;;  %v3296_v52 = vmul.f32 0.01, %v3254_v37 }
 0x20c   :  { %v1169_v56 = vpop.f32.mrf.mxu0  ;;  %v1282_v59 = vpop.f32.mrf.mxu1  ;;  %v3299_v51 = vadd.f32 %v1165_v32, %v3559_v62  ;;  %v3302_v53 = vadd.f32 %v1278_v20, %v3559_v62  ;;  %v3305_v39 = vmul.f32 0.01, %v3263_v18  ;;  %v3308_v45 = vmul.f32 0.01, %v3266_v35 }
 0x20d   :  { %v3313_v7 = vmul.f32 0.01, %v3275_v43  ;;  %v3316_v40 = vmul.f32 0.01, %v3278_v36  ;;  %v3321_v25 = vmul.f32 0.01, %v3284_v11  ;;  %v1170_v62 = vadd.f32 %v1169_v56, %v3560_v46 }
 0x20e   :  { %v1171_v5 = vpop.f32.mrf.mxu0  ;;  %v1284_v14 = vpop.f32.mrf.mxu1  ;;  %v1401_v19 = vmul.f32 0.01, %v3287_v0  ;;  %v1403_v16 = vmul.f32 0.01, %v3290_v31  ;;  %v1402_v20 = vmul.f32 0.01, %v3299_v51 }
 0x20f   :  { %v1172_v23 = vadd.f32 %v1171_v5, %v3560_v46  ;;  %v1285_v4 = vadd.f32 %v1284_v14, %v3560_v46  ;;  %v1404_v41 = vmul.f32 0.01, %v3302_v53  ;;  %v1283_v5 = vadd.f32 %v1282_v59, %v3560_v46 }
 0x210   :  { %v1175_v47 = vpop.f32.mrf.mxu0  ;;  %v1288_v58 = vpop.f32.mrf.mxu1  ;;  %v1409_v44 = vmul.f32 0.01, %v1170_v62  ;;  %vm1345_vm10 = vcmp.gt.f32.partialorder %v1170_v62, 0.0  ;;  %vm1338_vm15 = vcmp.gt.f32.partialorder %v3299_v51, 0.0  ;;  %vm1340_vm8 = vcmp.gt.f32.partialorder %v3302_v53, 0.0 }
 0x211   :  { %v1176_v22 = vadd.f32 %v1175_v47, %v3561_v42  ;;  %v1289_v15 = vadd.f32 %v1288_v58, %v3561_v42  ;;  %v1410_v14 = vmul.f32 0.01, %v1172_v23  ;;  %v1412_v47 = vmul.f32 0.01, %v1285_v4 }
 0x212   :  { %v1177_v27 = vpop.f32.mrf.mxu0  ;;  %v1290_v32 = vpop.f32.mrf.mxu1  ;;  %v1411_v63 = vmul.f32 0.01, %v1283_v5  ;;  %vm1346_vm7 = vcmp.gt.f32.partialorder %v1172_v23, 0.0  ;;  %vm1348_vm4 = vcmp.gt.f32.partialorder %v1285_v4, 0.0  ;;  %vm1347_vm14 = vcmp.gt.f32.partialorder %v1283_v5, 0.0 }
 0x213   :  { %v1178_v58 = vadd.f32 %v1177_v27, %v3561_v42  ;;  %v1291_v28 = vadd.f32 %v1290_v32, %v3561_v42  ;;  %vm1353_vm6 = vcmp.gt.f32.partialorder %v1176_v22, 0.0  ;;  %v1417_v1 = vmul.f32 0.01, %v1176_v22 }
 0x214   :  { %vm1355_vm2 = vcmp.gt.f32.partialorder %v1289_v15, 0.0  ;;  %v1419_v6 = vmul.f32 0.01, %v1289_v15  ;;  %vm1337_vm13 = vcmp.gt.f32.partialorder %v3287_v0, 0.0  ;;  %vm1339_vm9 = vcmp.gt.f32.partialorder %v3290_v31, 0.0 }
 0x215   :  { %v1418_v9 = vmul.f32 0.01, %v1178_v58  ;;  %v1420_v54 = vmul.f32 0.01, %v1291_v28  ;;  %vm1354_vm1 = vcmp.gt.f32.partialorder %v1178_v58, 0.0  ;;  %vm1356_vm3 = vcmp.gt.f32.partialorder %v1291_v28, 0.0 }
 0x216   :  { %v1481_v46 = vsel %vm1353_vm6, %v1176_v22, %v1417_v1  ;;  %v1483_v42 = vsel %vm1355_vm2, %v1289_v15, %v1419_v6  ;;  %v1474_v27 = vsel %vm1346_vm7, %v1172_v23, %v1410_v14  ;;  %v1473_v1 = vsel %vm1345_vm10, %v1170_v62, %v1409_v44 }
 0x217   :  { %v1482_v56 = vsel %vm1354_vm1, %v1178_v58, %v1418_v9  ;;  %v1484_v59 = vsel %vm1356_vm3, %v1291_v28, %v1420_v54  ;;  %v1476_v28 = vsel %vm1348_vm4, %v1285_v4, %v1412_v47  ;;  %v1475_v6 = vsel %vm1347_vm14, %v1283_v5, %v1411_v63 }
 0x218   :  { %1650 = vmatprep.subr.mxu0 %v1482_v56  ;;  %1721 = vmatprep.subr.mxu1 %v1484_v59  ;;  %vm1330_vm11 = vcmp.gt.f32.partialorder %v3278_v36, 0.0  ;;  %vm1332_vm12 = vcmp.gt.f32.partialorder %v3284_v11, 0.0  ;;  %vm1329_vm5 = vcmp.gt.f32.partialorder %v3266_v35, 0.0  ;;  %vm1331_vm6 = vcmp.gt.f32.partialorder %v3275_v43, 0.0 }
 0x219   :  { %1651 = vmatpush1.msra.mxu0 %v1481_v46  ;;  %1722 = vmatpush1.msra.mxu1 %v1483_v42  ;;  %v1466_v54 = vsel %vm1338_vm15, %v3299_v51, %v1402_v20  ;;  %v1468_v9 = vsel %vm1340_vm8, %v3302_v53, %v1404_v41  ;;  %v1465_v63 = vsel %vm1337_vm13, %v3287_v0, %v1401_v19  ;;  %vm1322_vm2 = vcmp.gt.f32.partialorder %v3254_v37, 0.0 }
 0x21a   :  { %1652 = vmatprep.subr.mxu0 %v1474_v27  ;;  %1723 = vmatprep.subr.mxu1 %v1476_v28  ;;  %v1467_v44 = vsel %vm1339_vm9, %v3290_v31, %v1403_v16  ;;  %vm1324_vm1 = vcmp.gt.f32.partialorder %v3263_v18, 0.0  ;;  %vm1321_vm3 = vcmp.gt.f32.partialorder %v3241_v12, 0.0  ;;  %vm1323_vm7 = vcmp.gt.f32.partialorder %v3251_v10, 0.0 }
 0x21b   :  { %1653 = vmatpush1.msra.mxu0 %v1473_v1  ;;  %1724 = vmatpush1.msra.mxu1 %v1475_v6  ;;  %v1458_v51 = vsel %vm1330_vm11, %v3278_v36, %v3316_v40  ;;  %v1460_v0 = vsel %vm1332_vm12, %v3284_v11, %v3321_v25  ;;  %v1457_v31 = vsel %vm1329_vm5, %v3266_v35, %v3308_v45  ;;  %vm1314_vm4 = vcmp.gt.f32.partialorder %v3223_v13, 0.0 }
 0x21c   :  { %1654 = vmatprep.subr.mxu0 %v1466_v54  ;;  %1725 = vmatprep.subr.mxu1 %v1468_v9  ;;  %v1459_v53 = vsel %vm1331_vm6, %v3275_v43, %v3313_v7  ;;  %vm1316_vm10 = vcmp.gt.f32.partialorder %v3227_v17, 0.0  ;;  %vm1313_vm14 = vcmp.gt.f32.partialorder %v3208_v8, 0.0  ;;  %vm1315_vm15 = vcmp.gt.f32.partialorder %v3212_v50, 0.0 }
 0x21d   :  { %1655 = vmatpush1.msra.mxu0 %v1465_v63  ;;  %1726 = vmatpush1.msra.mxu1 %v1467_v44  ;;  %v1450_v35 = vsel %vm1322_vm2, %v3254_v37, %v3296_v52  ;;  %v1452_v43 = vsel %vm1324_vm1, %v3263_v18, %v3305_v39  ;;  %v1449_v36 = vsel %vm1321_vm3, %v3241_v12, %v3281_v34  ;;  %vm1306_vm8 = vcmp.gt.f32.partialorder %v3193_v48, 0.0  ;;  %v3568_v34 = vld [vmem:[#allocation24_spill] sm:$0xff]  ;;  %v1487_v39 = vpop.permute.xlu0 %1486 }
 0x21e   :  { %1656 = vmatprep.subr.mxu0 %v1458_v51  ;;  %1727 = vmatprep.subr.mxu1 %v1460_v0  ;;  %v1451_v11 = vsel %vm1323_vm7, %v3251_v10, %v3293_v60  ;;  %vm1308_vm13 = vcmp.gt.f32.partialorder %v3197_v2, 0.0  ;;  %vm1305_vm9 = vcmp.gt.f32.partialorder %v3185_v30, 0.0  ;;  %vm1307_vm11 = vcmp.gt.f32.partialorder %v3189_v55, 0.0 }
 0x21f   :  { %1657 = vmatpush1.msra.mxu0 %v1457_v31  ;;  %1728 = vmatpush1.msra.mxu1 %v1459_v53  ;;  %v1442_v12 = vsel %vm1314_vm4, %v3223_v13, %v3269_v33  ;;  %v1444_v10 = vsel %vm1316_vm10, %v3227_v17, %v3272_v61  ;;  %v1441_v37 = vsel %vm1313_vm14, %v3208_v8, %v3257_v24  ;;  %vm1298_vm12 = vcmp.gt.f32.partialorder %v3173_v26, 0.0  ;;  %v3562_v13 = vld [vmem:[#allocation31_spill] sm:$0xff]  ;;  %v3563_v24 = vld [vmem:[#allocation26_spill] sm:$0xff]  ;;  %v3567_v61 = vld [vmem:[#allocation29_spill] sm:$0xff] }
 0x220   :  { %1658 = vmatprep.subr.mxu0 %v1450_v35  ;;  %1729 = vmatprep.subr.mxu1 %v1452_v43  ;;  %v1443_v18 = vsel %vm1315_vm15, %v3212_v50, %v3260_v21  ;;  %vm1300_vm5 = vcmp.gt.f32.partialorder %v3181_v49, 0.0  ;;  %vm1297_vm6 = vcmp.gt.f32.partialorder %v3152_v57, 0.0  ;;  %vm1299_vm2 = vcmp.gt.f32.partialorder %v3169_v3, 0.0  ;;  %v3565_v33 = vld [vmem:[#allocation22_spill] sm:$0xff] }
 0x221   :  { %1659 = vmatpush1.msra.mxu0 %v1449_v36  ;;  %1730 = vmatpush1.msra.mxu1 %v1451_v11  ;;  %v1434_v8 = vsel %vm1306_vm8, %v3193_v48, %v3244_v38  ;;  %v1436_v50 = vsel %vm1308_vm13, %v3197_v2, %v3247_v29  ;;  %v1433_v17 = vsel %vm1305_vm9, %v3185_v30, %v3562_v13  ;;  %v3564_v48 = vld [vmem:[#allocation25_spill] sm:$0xff]  ;;  %v3566_v29 = vld [vmem:[#allocation28_spill] sm:$0xff]  ;;  %vm1912_vm8 = vcmask 57344  }
 0x222   :  { %1660 = vmatprep.subr.mxu0 %v1442_v12  ;;  %1731 = vmatprep.subr.mxu1 %v1444_v10  ;;  %v1435_v21 = vsel %vm1307_vm11, %v3189_v55, %v3563_v24  ;;  %v1426_v38 = vsel %vm1298_vm12, %v3173_v26, %v3564_v48  ;;  %v1428_v2 = vsel %vm1300_vm5, %v3181_v49, %v3565_v33  ;;  %v2081_v12 = vmov 1983009808  }
 0x223   :  { %1661 = vmatpush1.msra.mxu0 %v1441_v37  ;;  %1732 = vmatpush1.msra.mxu1 %v1443_v18  ;;  %v1425_v30 = vsel %vm1297_vm6, %v3152_v57, %v3566_v29  ;;  %v1427_v55 = vsel %vm1299_vm2, %v3169_v3, %v3567_v61  ;;  %v1842_v10 = vunpack.c.l.s4 %v2081_v12 }
 0x224   :  { %1662 = vmatprep.subr.mxu0 %v1434_v8  ;;  %1733 = vmatprep.subr.mxu1 %v1436_v50  ;;  %v1844_v50 = vlaneseq }
 0x225   :  { %1663 = vmatpush1.msra.mxu0 %v1433_v17  ;;  %1734 = vmatpush1.msra.mxu1 %v1435_v21  ;;  %v1843_v48 = vunpack.c.0.s8 %v1842_v10 }
 0x226   :  { %1664 = vmatprep.subr.mxu0 %v1426_v38  ;;  %1735 = vmatprep.subr.mxu1 %v1428_v2  ;;  %v3569_v38 = vld [vmem:[#allocation8_spill] sm:$0xff]  ;;  %v3570_v2 = vld [vmem:[#allocation9_spill] sm:$0xff] }
 0x227   :  { %1665 = vmatpush1.msra.mxu0 %v1425_v30  ;;  %1736 = vmatpush1.msra.mxu1 %v1427_v55 }
 0x228   :  { %2003 = vmatmul.mubr.msk.f32.vlgmr.msra.gmra.mxu0 %vm816_vm0, %v3568_v34  ;;  %2004 = vmatmul.mubr.msk.f32.vlgmr.msra.gmra.mxu1 %vm816_vm0, %v3568_v34  ;;  %v3571_v34 = vld [vmem:[#allocation10_spill] sm:$0xff] }
 0x2c6   :  { %v1558_v26 = vpop.f32.mrf.mxu0  ;;  %v1629_v49 = vpop.f32.mrf.mxu1 }
 0x2c7   :  { %v1559_v23 = vadd.f32 %v1558_v26, %v1487_v39  ;;  %v1630_v4 = vadd.f32 %v1629_v49, %v1487_v39  ;;  %v1845_v49 = vshrl.u32 %v1844_v50, 7 }
 0x2c8   :  { %v1560_v60 = vpop.f32.mrf.mxu0  ;;  %v1631_v52 = vpop.f32.mrf.mxu1 }
 0x2c9   :  { %v1561_v45 = vadd.f32 %v1560_v60, %v1487_v39  ;;  %v1632_v57 = vadd.f32 %v1631_v52, %v1487_v39  ;;  %v1784_v3 = vmin.f32 %v1559_v23, 0.0  ;;  %v1786_v22 = vmin.f32 %v1630_v4, 0.0 }
 0x2ca   :  { %vm1776_vm3 = vcmp.gt.f32.partialorder %v1559_v23, 0.0  ;;  %vm1778_vm7 = vcmp.gt.f32.partialorder %v1630_v4, 0.0 }
 0x2cb   :  { %v1785_v7 = vmin.f32 %v1561_v45, 0.0  ;;  %v1787_v40 = vmin.f32 %v1632_v57, 0.0  ;;  %v1792_v19 = vmul.f32 1.442695, %v1784_v3  ;;  %v1796_v16 = vmul.f32 1.442695, %v1786_v22 }
 0x2cc   :  { %vm1777_vm0 = vcmp.gt.f32.partialorder %v1561_v45, 0.0  ;;  %vm1779_vm1 = vcmp.gt.f32.partialorder %v1632_v57, 0.0 }
 0x2cd   :  { %v1794_v15 = vmul.f32 1.442695, %v1785_v7  ;;  %v1798_v25 = vmul.f32 1.442695, %v1787_v40  ;;  %v2082_v40 = vmov 1934713408  }
 0x2ce   :  { %v1874_v3 = vunpack.c.l.s4 %v2082_v40 }
 0x2cf   :  { %2025 = vpow2.f32 %v1794_v15  ;;  %v3573_v15 = vld [vmem:[#allocation14_spill] sm:$0xff] }
 0x2d0   :  { %2027 = vpow2.f32 %v1798_v25 }
 0x2d1   :  { %2029 = vpow2.f32 %v1792_v19 }
 0x2d2   :  { %2031 = vpow2.f32 %v1796_v16  ;;  %v3574_v16 = vld [vmem:[#allocation15_spill] sm:$0xff] }
 0x2dc   :  { %v2026_v1 = vpop.eup %2025 }
 0x2dd   :  { %v2028_v6 = vpop.eup %2027  ;;  %v2006_v51 = vadd.f32 -1.0, %v2026_v1  ;;  %v1875_v1 = vunpack.c.0.s8 %v1874_v3 }
 0x2de   :  { %v2030_v63 = vpop.eup %2029  ;;  %v2008_v0 = vadd.f32 -1.0, %v2028_v6 }
 0x2df   :  { %v2032_v44 = vpop.eup %2031  ;;  %v2005_v31 = vadd.f32 -1.0, %v2030_v63  ;;  %v1817_v35 = vsel %vm1777_vm0, %v1561_v45, %v2006_v51 }
 0x2e0   :  { %v2007_v53 = vadd.f32 -1.0, %v2032_v44  ;;  %v1819_v43 = vsel %vm1779_vm1, %v1632_v57, %v2008_v0  ;;  %v1825_v37 = vadd.f32 1.0, %v1817_v35  ;;  %v3572_v57 = vld [vmem:[#allocation11_spill] sm:$0xff]  ;;  %v1878_v44 = vsub.s32 %v1875_v1, %v1845_v49 }
 0x2e1   :  { %v1816_v36 = vsel %vm1776_vm3, %v1559_v23, %v2005_v31  ;;  %v1827_v18 = vadd.f32 1.0, %v1819_v43  ;;  %v1898_v35 = vstv %s2013_s2  ;;  %v1895_v43 = vstv %s1894_s22 }
 0x2e2   :  { %v1818_v11 = vsel %vm1778_vm7, %v1630_v4, %v2007_v53  ;;  %v1824_v8 = vadd.f32 1.0, %v1816_v36  ;;  %v1833_v33 = vmul.f32 %v1825_v37, %v3569_v38  ;;  %v1906_v36 = vand.u32 127, %v1844_v50 }
 0x2e3   :  { %v1826_v17 = vadd.f32 1.0, %v1818_v11  ;;  %v1835_v29 = vmul.f32 %v1827_v18, %v3570_v2  ;;  %v1902_v18 = vstv %s2014_s23 }
 0x2e4   :  { %v1832_v26 = vmul.f32 %v1824_v8, %v3571_v34 }
 0x2e5   :  { %v1834_v23 = vmul.f32 %v1826_v17, %v3572_v57  ;;  %v1848_v22 = vcombine.low %v1833_v33, %v1835_v29 }
 0x2e8   :  { %v1700_v32 = vpop.f32.mrf.mxu0  ;;  %v1771_v20 = vpop.f32.mrf.mxu1 }
 0x2e9   :  { %v1701_v41 = vadd.f32 %v1700_v32, %v1487_v39  ;;  %v1772_v62 = vadd.f32 %v1771_v20, %v1487_v39 }
 0x2ea   :  { %v1702_v5 = vpop.f32.mrf.mxu0  ;;  %v1773_v14 = vpop.f32.mrf.mxu1 }
 0x2eb   :  { %v1788_v47 = vmin.f32 %v1701_v41, 0.0  ;;  %v1790_v58 = vmin.f32 %v1772_v62, 0.0  ;;  %v1703_v56 = vadd.f32 %v1702_v5, %v1487_v39  ;;  %v3453_v59 = vadd.f32 %v1773_v14, %v1487_v39 }
 0x2ec   :  { %vm1780_vm4 = vcmp.gt.f32.partialorder %v1701_v41, 0.0  ;;  %vm1782_vm10 = vcmp.gt.f32.partialorder %v1772_v62, 0.0  ;;  %v1840_v5 = vcombine.low %v1832_v26, %v1834_v23  ;;  %v1846_v14 = vsub.s32 %v1843_v48, %v1845_v49 }
 0x2ed   :  { %v1800_v46 = vmul.f32 1.442695, %v1788_v47  ;;  %v1804_v42 = vmul.f32 1.442695, %v1790_v58  ;;  %v1789_v27 = vmin.f32 %v1703_v56, 0.0  ;;  %v1791_v28 = vmin.f32 %v3453_v59, 0.0 }
 0x2ee   :  { %vm1781_vm14 = vcmp.gt.f32.partialorder %v1703_v56, 0.0  ;;  %vm1783_vm15 = vcmp.gt.f32.partialorder %v3453_v59, 0.0  ;;  %v3575_v47 = vld [vmem:[#allocation12_spill] sm:$0xff] }
 0x2ef   :  { %2033 = vpow2.f32 %v1800_v46  ;;  %v1802_v54 = vmul.f32 1.442695, %v1789_v27  ;;  %v1806_v9 = vmul.f32 1.442695, %v1791_v28  ;;  %v1855_v28 = vrot.slane %v1848_v22, %v1846_v14 }
 0x2f0   :  { %2035 = vpow2.f32 %v1804_v42  ;;  %v3576_v42 = vld [vmem:[#allocation13_spill] sm:$0xff] }
 0x2f1   :  { %2037 = vpow2.f32 %v1802_v54  ;;  %v1847_v54 = vrot.slane %v1840_v5, %v1846_v14 }
 0x2f2   :  { %2039 = vpow2.f32 %v1806_v9 }
 0x2f3   :  { %v1872_v63 = vcombine.low %v1847_v54, %v1855_v28 }
 0x2f5   :  { %v1879_v0 = vrot.slane %v1872_v63, %v1878_v44 }
 0x2fc   :  { %v2034_v13 = vpop.eup %2033 }
 0x2fd   :  { %v2036_v24 = vpop.eup %2035  ;;  %v2009_v21 = vadd.f32 -1.0, %v2034_v13  ;;  %v1909_v13 = vsub.s32 %v1906_v36, %v1845_v49 }
 0x2fe   :  { %v2011_v30 = vadd.f32 -1.0, %v2036_v24  ;;  %v2038_v61 = vpop.eup %2037 }
 0x2ff   :  { %v1820_v55 = vsel %vm1780_vm4, %v1701_v41, %v2009_v21  ;;  %v2040_v60 = vpop.eup %2039  ;;  %v2010_v45 = vadd.f32 -1.0, %v2038_v61 }
 0x300   :  { %v1828_v52 = vadd.f32 1.0, %v1820_v55  ;;  %v1822_v39 = vsel %vm1782_vm10, %v1772_v62, %v2011_v30  ;;  %v2012_v7 = vadd.f32 -1.0, %v2040_v60 }
 0x301   :  { %v1830_v4 = vadd.f32 1.0, %v1822_v39  ;;  %v1821_v19 = vsel %vm1781_vm14, %v1703_v56, %v2010_v45 }
 0x302   :  { %v1836_v25 = vmul.f32 %v1828_v52, %v3573_v15  ;;  %v1829_v20 = vadd.f32 1.0, %v1821_v19  ;;  %v1823_v41 = vsel %vm1783_vm15, %v3453_v59, %v2012_v7 }
 0x303   :  { %v1838_v32 = vmul.f32 %v1830_v4, %v3574_v16  ;;  %v1831_v62 = vadd.f32 1.0, %v1823_v41 }
 0x304   :  { %v1837_v58 = vmul.f32 %v1829_v20, %v3575_v47 }
 0x305   :  { %v1856_v46 = vcombine.low %v1836_v25, %v1838_v32  ;;  %v1839_v27 = vmul.f32 %v1831_v62, %v3576_v42 }
 0x307   :  { %v1864_v6 = vcombine.low %v1837_v58, %v1839_v27  ;;  %v1863_v56 = vrot.slane %v1856_v46, %v1846_v14 }
 0x309   :  { %v1871_v9 = vrot.slane %v1864_v6, %v1846_v14 }
 0x30b   :  { %v1880_v51 = vcombine.low %v1863_v56, %v1871_v9 }
 0x30d   :  { %v1887_v31 = vrot.slane %v1880_v51, %v1878_v44 }
 0x30f   :  { %v1889_v59 = vcombine.high %v1879_v0, %v1887_v31  ;;  %v1888_v53 = vcombine.low %v1879_v0, %v1887_v31 }
 0x311   :  { %1892 = vadd.xlane.f32.xlu0 %v1889_v59  ;;  %1890 = vadd.xlane.f32.xlu1 %v1888_v53 }
 0x39a   :  { %v1893_v11 = vpop.xlane.xlu0 %1892  ;;  %v1891_v12 = vpop.xlane.xlu1 %1890 }
 0x39b   :  { %v1899_v10 = vmul.f32 %v1898_v35, %v1893_v11  ;;  %v1896_v37 = vmul.f32 %v1895_v43, %v1891_v12 }
 0x39d   :  { %v1900_v8 = vadd.f32 %v1899_v10, %v1896_v37 }
 0x39f   :  { %v1903_v17 = vadd.f32 %v1902_v18, %v1900_v8 }
 0x3a1   :  { %v1910_v24 = vrot.slane %v1903_v17, %v1909_v13 }
 0x3a3   :  { %1913 = vst.msk [vmem:[#allocation5] sm:$0x1] %vm1912_vm8, %v1910_v24 }
 0x3a4   :  { %2064 = shalt.err (!%p2061_p9)
}
 0x3a5   :  { %1923 = dma.vmem_to_hbm [thread:$0]  %s1921_s25, 16, %s3474_s5, [#allocation3]  }
 0x3a6   :  { %2075 = dma.done.wait [#allocation3], 16  }
 0x3a7   :  { %2076 = vsyncadd [#allocation3], 4294967280 }
 0x3a8   :  { %1927 = vsyncpa [#allocation3], 1 }
 0x3a9   :  { %1928 = vsyncpa [#allocation4], 1 }

</bundles_post_ra>
